<compile_context>
chip_gen: v7x
topology: tpu7x:2x2x1
jax: 0.10.0
libtpu: 0.0.40
codegen_flags: <defaults>
</compile_context>

<pallas_src>
import functools
import math

import jax
import jax.numpy as jnp
from jax.experimental import pallas as pl
from jax.experimental.pallas import tpu as pltpu


# ---------------------------------------------------------------------------
# Helpers
# ---------------------------------------------------------------------------
_INV_SQRT2 = 1.0 / math.sqrt(2.0)


def _layernorm(x, gamma, beta, eps=1e-5):
    """torch.nn.LayerNorm (last dim, eps=1e-5, affine), computed in f32."""
    mu = jnp.mean(x, axis=-1, keepdims=True)
    var = jnp.mean((x - mu) * (x - mu), axis=-1, keepdims=True)
    return (x - mu) * jax.lax.rsqrt(var + eps) * gamma + beta


def _split_heads(t, heads, dim_head):
    """(rows, heads*dim_head) -> (heads, rows, dim_head) via static slices."""
    return jnp.stack(
        [t[:, h * dim_head:(h + 1) * dim_head] for h in range(heads)], axis=0)


def _pick_tq(n):
    """Query-tile size: multiple of 8 that divides N (full N for tiny demos)."""
    for t in (128, 256):
        if n % t == 0:
            return t
    return n


# ---------------------------------------------------------------------------
# Fused per-layer kernel:  x -> x + Attn(LN1(x)) -> (+ FF(LN2(.)))
# ---------------------------------------------------------------------------
def layer_kernel(x_ref, ln1g_ref, ln1b_ref, wq_ref, wkv_ref, wo_ref, bo_ref,
                 ln2g_ref, ln2b_ref, w1_ref, b1_ref, w2_ref, b2_ref,
                 o_ref, k_scr, v_scr, *, heads, dim_head, tq):
    H, Dh = heads, dim_head
    inner = H * Dh

    # ---- K/V for the full sequence: computed once per batch element --------
    @pl.when(pl.program_id(1) == 0)
    def _fill_kv():
        hf = _layernorm(x_ref[0], ln1g_ref[0], ln1b_ref[0])          # (N, D) f32
        kv = jnp.dot(hf.astype(jnp.bfloat16), wkv_ref[...],
                     preferred_element_type=jnp.float32)             # (N, 2*inner)
        k_scr[...] = _split_heads(kv[:, :inner], H, Dh).astype(jnp.bfloat16)
        v_scr[...] = _split_heads(kv[:, inner:], H, Dh).astype(jnp.bfloat16)

    # ---- Attention for this query tile --------------------------------------
    row0 = pl.multiple_of(pl.program_id(1) * tq, tq)
    xq = x_ref[0, pl.ds(row0, tq), :]                                # (TQ, D) f32
    hq = _layernorm(xq, ln1g_ref[0], ln1b_ref[0])                    # (TQ, D) f32

    # scale (dim_head**-0.5) is pre-folded into W_q at init
    q = jnp.dot(hq.astype(jnp.bfloat16), wq_ref[...],
                preferred_element_type=jnp.float32)                  # (TQ, inner)
    qh = _split_heads(q, H, Dh).astype(jnp.bfloat16)                 # (H, TQ, Dh)

    dots = jnp.einsum('hqd,hkd->hqk', qh, k_scr[...],
                      preferred_element_type=jnp.float32)            # (H, TQ, N)
    dots = dots - jnp.max(dots, axis=-1, keepdims=True)              # stable softmax
    e = jnp.exp(dots)
    p = e * pl.reciprocal(jnp.sum(e, axis=-1, keepdims=True), approx=True)

    ctx = jnp.einsum('hqk,hkd->hqd', p.astype(jnp.bfloat16), v_scr[...],
                     preferred_element_type=jnp.float32)             # (H, TQ, Dh)

    # output projection: sum_h ctx_h @ Wo_h  (no concat, batched over heads)
    y = jnp.einsum('hqd,hdo->hqo', ctx.astype(jnp.bfloat16), wo_ref[...],
                   preferred_element_type=jnp.float32)               # (H, TQ, D)
    y = jnp.sum(y, axis=0) + bo_ref[0]
    x1 = xq + y                                                      # residual 1

    # ---- FeedForward ---------------------------------------------------------
    h2 = _layernorm(x1, ln2g_ref[0], ln2b_ref[0])
    a1 = jnp.dot(h2.astype(jnp.bfloat16), w1_ref[...],
                 preferred_element_type=jnp.float32) + b1_ref[0]     # (TQ, mlp)
    g = 0.5 * a1 * (1.0 + jax.lax.erf(a1 * _INV_SQRT2))              # exact GELU, f32
    y2 = jnp.dot(g.astype(jnp.bfloat16), w2_ref[...],
                 preferred_element_type=jnp.float32) + b2_ref[0]     # (TQ, D)

    o_ref[0] = (x1 + y2).astype(o_ref.dtype)                         # residual 2


# ---------------------------------------------------------------------------
# Wrapper: one pallas_call per layer
# ---------------------------------------------------------------------------
def transformer_layer(x, p, *, heads, dim_head):
    B, N, D = x.shape
    inner = heads * dim_head
    mlp_dim = p["w1"].shape[1]
    tq = _pick_tq(N)
    nq = N // tq

    kern = functools.partial(layer_kernel, heads=heads, dim_head=dim_head, tq=tq)

    def rep(shape):  # weights / params: resident (constant block index)
        return pl.BlockSpec(shape, lambda b, q, _s=len(shape): (0,) * _s)

    return pl.pallas_call(
        kern,
        out_shape=jax.ShapeDtypeStruct((B, N, D), x.dtype),
        grid=(B, nq),
        in_specs=[
            # x: full sequence per batch element, resident across query tiles
            pl.BlockSpec((1, N, D), lambda b, q: (b, 0, 0)),
            rep((1, D)), rep((1, D)),                 # LN1 gamma/beta (f32)
            rep((D, inner)),                          # W_q  (bf16, scale folded)
            rep((D, 2 * inner)),                      # W_kv (bf16)
            rep((heads, dim_head, D)),                # W_o per head (bf16)
            rep((1, D)),                              # b_o  (f32)
            rep((1, D)), rep((1, D)),                 # LN2 gamma/beta (f32)
            rep((D, mlp_dim)), rep((1, mlp_dim)),     # W1 (bf16), b1 (f32)
            rep((mlp_dim, D)), rep((1, D)),           # W2 (bf16), b2 (f32)
        ],
        out_specs=pl.BlockSpec((1, tq, D), lambda b, q: (b, q, 0)),
        scratch_shapes=[
            pltpu.VMEM((heads, N, dim_head), jnp.bfloat16),   # K (all heads)
            pltpu.VMEM((heads, N, dim_head), jnp.bfloat16),   # V (all heads)
        ],
        compiler_params=pltpu.CompilerParams(
            # batch axis parallel (megacore / v7x 2-TC); query-tile axis is
            # sequential because it reuses the per-batch K/V scratch.
            dimension_semantics=("parallel", "arbitrary"),
        ),
    )(x, p["ln1_g"], p["ln1_b"], p["w_q"], p["w_kv"], p["w_o"], p["b_o"],
      p["ln2_g"], p["ln2_b"], p["w1"], p["b1"], p["w2"], p["b2"])


@functools.partial(jax.jit, static_argnames=("heads", "dim_head"))
def transformer_forward(x, layers, *, heads, dim_head):
    for p in layers:
        x = transformer_layer(x, p, heads=heads, dim_head=dim_head)
    return x


# ---------------------------------------------------------------------------
# Deterministic parameter init (shapes follow the PyTorch module __init__)
# ---------------------------------------------------------------------------
def init_transformer_params(key, *, dim, depth, heads, dim_head, mlp_dim):
    inner = heads * dim_head
    scale = dim_head ** (-0.5)
    layers = []
    for _ in range(depth):
        key, k1, k2, k3, k4, k5, k6 = jax.random.split(key, 7)
        w_qkv = 0.05 * jax.random.normal(k1, (dim, 3 * inner), jnp.float32)
        w_out = 0.05 * jax.random.normal(k2, (inner, dim), jnp.float32)
        p = {
            "ln1_g": jnp.ones((1, dim), jnp.float32),
            "ln1_b": jnp.zeros((1, dim), jnp.float32),
            # attention scale folded into W_q; weights stored bf16 for MXU/DMA
            "w_q": (w_qkv[:, :inner] * scale).astype(jnp.bfloat16),
            "w_kv": w_qkv[:, inner:].astype(jnp.bfloat16),
            # to_out weight reshaped per head: (heads, dim_head, dim)
            "w_o": w_out.reshape(heads, dim_head, dim).astype(jnp.bfloat16),
            "b_o": 0.05 * jax.random.normal(k3, (1, dim), jnp.float32),
            "ln2_g": jnp.ones((1, dim), jnp.float32),
            "ln2_b": jnp.zeros((1, dim), jnp.float32),
            "w1": (0.05 * jax.random.normal(k4, (dim, mlp_dim), jnp.float32)
                   ).astype(jnp.bfloat16),
            "b1": 0.05 * jax.random.normal(k5, (1, mlp_dim), jnp.float32),
            "w2": (0.05 * jax.random.normal(k6, (mlp_dim, dim), jnp.float32)
                   ).astype(jnp.bfloat16),
            "b2": jnp.zeros((1, dim), jnp.float32),
        }
        layers.append(p)
    return layers


# ---------------------------------------------------------------------------
if __name__ == "__main__":
    # Small ViT-style config consistent with the module:
    B, N = 2, 8          # batch, tokens
    DIM = 32             # embedding dim
    DEPTH = 2
    HEADS = 4
    DIM_HEAD = 8
    MLP_DIM = 64

    key = jax.random.PRNGKey(0)
    key, xk = jax.random.split(key)
    x = jax.random.normal(xk, (B, N, DIM), jnp.float32)

    layers = init_transformer_params(
        key, dim=DIM, depth=DEPTH, heads=HEADS, dim_head=DIM_HEAD, mlp_dim=MLP_DIM)

    out = transformer_forward(x, layers, heads=HEADS, dim_head=DIM_HEAD)
    out = jax.block_until_ready(out)
    assert out.shape == (B, N, DIM) and out.dtype == jnp.float32
    assert bool(jnp.all(jnp.isfinite(out)))
    print("KERNEL_OK")
</pallas_src>

<mosaic_0001>
module attributes {stable_mosaic.version = 11 : i64} {
  func.func @layer_kernel(%arg0: i32, %arg1: i32, %arg2: memref<1x8x32xf32, #tpu.memory_space<vmem>>, %arg3: memref<1x32xf32, #tpu.memory_space<vmem>>, %arg4: memref<1x32xf32, #tpu.memory_space<vmem>>, %arg5: memref<32x32xbf16, #tpu.memory_space<vmem>>, %arg6: memref<32x64xbf16, #tpu.memory_space<vmem>>, %arg7: memref<4x8x32xbf16, #tpu.memory_space<vmem>>, %arg8: memref<1x32xf32, #tpu.memory_space<vmem>>, %arg9: memref<1x32xf32, #tpu.memory_space<vmem>>, %arg10: memref<1x32xf32, #tpu.memory_space<vmem>>, %arg11: memref<32x64xbf16, #tpu.memory_space<vmem>>, %arg12: memref<1x64xf32, #tpu.memory_space<vmem>>, %arg13: memref<64x32xbf16, #tpu.memory_space<vmem>>, %arg14: memref<1x32xf32, #tpu.memory_space<vmem>>, %arg15: memref<1x8x32xf32, #tpu.memory_space<vmem>>, %arg16: memref<4x8x8xbf16, #tpu.memory_space<vmem>>, %arg17: memref<4x8x8xbf16, #tpu.memory_space<vmem>>) attributes {dimension_semantics = [#tpu.dimension_semantics<parallel>, #tpu.dimension_semantics<arbitrary>], iteration_bounds = array<i64: 2, 1>, scalar_prefetch = 0 : i64, scratch_operands = 2 : i64, tpu.core_type = #tpu.core_type<tc>, window_params = [{transform_indices = @transform_0, window_bounds = array<i64: 1, 8, 32>}, {pipeline_mode = #tpu.pipeline_mode<synchronous>, transform_indices = @transform_1, window_bounds = array<i64: 1, 32>}, {pipeline_mode = #tpu.pipeline_mode<synchronous>, transform_indices = @transform_2, window_bounds = array<i64: 1, 32>}, {pipeline_mode = #tpu.pipeline_mode<synchronous>, transform_indices = @transform_3, window_bounds = array<i64: 32, 32>}, {pipeline_mode = #tpu.pipeline_mode<synchronous>, transform_indices = @transform_4, window_bounds = array<i64: 32, 64>}, {pipeline_mode = #tpu.pipeline_mode<synchronous>, transform_indices = @transform_5, window_bounds = array<i64: 4, 8, 32>}, {pipeline_mode = #tpu.pipeline_mode<synchronous>, transform_indices = @transform_6, window_bounds = array<i64: 1, 32>}, {pipeline_mode = #tpu.pipeline_mode<synchronous>, transform_indices = @transform_7, window_bounds = array<i64: 1, 32>}, {pipeline_mode = #tpu.pipeline_mode<synchronous>, transform_indices = @transform_8, window_bounds = array<i64: 1, 32>}, {pipeline_mode = #tpu.pipeline_mode<synchronous>, transform_indices = @transform_9, window_bounds = array<i64: 32, 64>}, {pipeline_mode = #tpu.pipeline_mode<synchronous>, transform_indices = @transform_10, window_bounds = array<i64: 1, 64>}, {pipeline_mode = #tpu.pipeline_mode<synchronous>, transform_indices = @transform_11, window_bounds = array<i64: 64, 32>}, {pipeline_mode = #tpu.pipeline_mode<synchronous>, transform_indices = @transform_12, window_bounds = array<i64: 1, 32>}, {transform_indices = @transform_13, window_bounds = array<i64: 1, 8, 32>}]} {
    %c0_i32 = arith.constant 0 : i32
    %0 = arith.cmpi eq, %arg1, %c0_i32 : i32
    %1 = arith.extui %0 : i1 to i32
    %c0_i32_0 = arith.constant 0 : i32
    %2 = arith.cmpi ne, %1, %c0_i32_0 : i32
    scf.if %2 {
      %c0_55 = arith.constant 0 : index
      %c0_56 = arith.constant 0 : index
      %c0_57 = arith.constant 0 : index
      %134 = vector.load %arg2[%c0_55, %c0_56, %c0_57] : memref<1x8x32xf32, #tpu.memory_space<vmem>>, vector<1x8x32xf32>
      %135 = vector.shape_cast %134 : vector<1x8x32xf32> to vector<8x32xf32>
      %c0_58 = arith.constant 0 : index
      %c0_59 = arith.constant 0 : index
      %136 = vector.load %arg3[%c0_58, %c0_59] : memref<1x32xf32, #tpu.memory_space<vmem>>, vector<1x32xf32>
      %137 = vector.shape_cast %136 : vector<1x32xf32> to vector<32xf32>
      %c0_60 = arith.constant 0 : index
      %c0_61 = arith.constant 0 : index
      %138 = vector.load %arg4[%c0_60, %c0_61] : memref<1x32xf32, #tpu.memory_space<vmem>>, vector<1x32xf32>
      %139 = vector.shape_cast %138 : vector<1x32xf32> to vector<32xf32>
      %cst_62 = arith.constant dense<0.000000e+00> : vector<8xf32>
      %140 = vector.multi_reduction <add>, %135, %cst_62 [1] : vector<8x32xf32> to vector<8xf32>
      %141 = vector.shape_cast %140 : vector<8xf32> to vector<8x1xf32>
      %cst_63 = arith.constant 3.200000e+01 : f32
      %142 = vector.broadcast %cst_63 : f32 to vector<8x1xf32>
      %143 = arith.divf %141, %142 : vector<8x1xf32>
      %144 = vector.broadcast %143 : vector<8x1xf32> to vector<8x32xf32>
      %145 = arith.subf %135, %144 : vector<8x32xf32>
      %146 = vector.broadcast %143 : vector<8x1xf32> to vector<8x32xf32>
      %147 = arith.subf %135, %146 : vector<8x32xf32>
      %148 = arith.mulf %145, %147 : vector<8x32xf32>
      %cst_64 = arith.constant dense<0.000000e+00> : vector<8xf32>
      %149 = vector.multi_reduction <add>, %148, %cst_64 [1] : vector<8x32xf32> to vector<8xf32>
      %150 = vector.shape_cast %149 : vector<8xf32> to vector<8x1xf32>
      %cst_65 = arith.constant 3.200000e+01 : f32
      %151 = vector.broadcast %cst_65 : f32 to vector<8x1xf32>
      %152 = arith.divf %150, %151 : vector<8x1xf32>
      %153 = vector.broadcast %143 : vector<8x1xf32> to vector<8x32xf32>
      %154 = arith.subf %135, %153 : vector<8x32xf32>
      %cst_66 = arith.constant 9.99999974E-6 : f32
      %155 = vector.broadcast %cst_66 : f32 to vector<8x1xf32>
      %156 = arith.addf %152, %155 : vector<8x1xf32>
      %157 = math.rsqrt %156 : vector<8x1xf32>
      %158 = vector.broadcast %157 : vector<8x1xf32> to vector<8x32xf32>
      %159 = arith.mulf %154, %158 : vector<8x32xf32>
      %160 = vector.shape_cast %137 : vector<32xf32> to vector<1x32xf32>
      %161 = vector.broadcast %160 : vector<1x32xf32> to vector<8x32xf32>
      %162 = arith.mulf %159, %161 : vector<8x32xf32>
      %163 = vector.shape_cast %139 : vector<32xf32> to vector<1x32xf32>
      %164 = vector.broadcast %163 : vector<1x32xf32> to vector<8x32xf32>
      %165 = arith.addf %162, %164 : vector<8x32xf32>
      %166 = arith.truncf %165 : vector<8x32xf32> to vector<8x32xbf16>
      %c0_67 = arith.constant 0 : index
      %c0_68 = arith.constant 0 : index
      %167 = vector.load %arg6[%c0_67, %c0_68] : memref<32x64xbf16, #tpu.memory_space<vmem>>, vector<32x64xbf16>
      %cst_69 = arith.constant dense<0.000000e+00> : vector<8x64xf32>
      %168 = tpu.matmul %166, %167, %cst_69 {dimension_numbers = #tpu.dot_dimension_numbers<[1], [0], [0], [1], [0, 0, 1, 1], [], []>} : vector<8x32xbf16>, vector<32x64xbf16>, vector<8x64xf32> -> vector<8x64xf32>
      %169 = vector.extract_strided_slice %168 {offsets = [0, 0], sizes = [8, 32], strides = [1, 1]} : vector<8x64xf32> to vector<8x32xf32>
      %170 = vector.extract_strided_slice %169 {offsets = [0, 0], sizes = [8, 8], strides = [1, 1]} : vector<8x32xf32> to vector<8x8xf32>
      %171 = vector.extract_strided_slice %169 {offsets = [0, 8], sizes = [8, 8], strides = [1, 1]} : vector<8x32xf32> to vector<8x8xf32>
      %172 = vector.extract_strided_slice %169 {offsets = [0, 16], sizes = [8, 8], strides = [1, 1]} : vector<8x32xf32> to vector<8x8xf32>
      %173 = vector.extract_strided_slice %169 {offsets = [0, 24], sizes = [8, 8], strides = [1, 1]} : vector<8x32xf32> to vector<8x8xf32>
      %174 = vector.shape_cast %170 : vector<8x8xf32> to vector<1x8x8xf32>
      %175 = vector.shape_cast %171 : vector<8x8xf32> to vector<1x8x8xf32>
      %176 = vector.shape_cast %172 : vector<8x8xf32> to vector<1x8x8xf32>
      %177 = vector.shape_cast %173 : vector<8x8xf32> to vector<1x8x8xf32>
      %178 = tpu.concatenate %174, %175, %176, %177 in 0 : vector<1x8x8xf32>, vector<1x8x8xf32>, vector<1x8x8xf32>, vector<1x8x8xf32> -> vector<4x8x8xf32>
      %179 = arith.truncf %178 : vector<4x8x8xf32> to vector<4x8x8xbf16>
      %c0_70 = arith.constant 0 : index
      %c0_71 = arith.constant 0 : index
      %c0_72 = arith.constant 0 : index
      %180 = vector.load %arg16[%c0_70, %c0_71, %c0_72] : memref<4x8x8xbf16, #tpu.memory_space<vmem>>, vector<4x8x8xbf16>
      tpu.vector_store %arg16[%c0_70, %c0_71, %c0_72], %179 {strides = array<i32>} : memref<4x8x8xbf16, #tpu.memory_space<vmem>>, vector<4x8x8xbf16>,
      %181 = vector.extract_strided_slice %168 {offsets = [0, 32], sizes = [8, 32], strides = [1, 1]} : vector<8x64xf32> to vector<8x32xf32>
      %182 = vector.extract_strided_slice %181 {offsets = [0, 0], sizes = [8, 8], strides = [1, 1]} : vector<8x32xf32> to vector<8x8xf32>
      %183 = vector.extract_strided_slice %181 {offsets = [0, 8], sizes = [8, 8], strides = [1, 1]} : vector<8x32xf32> to vector<8x8xf32>
      %184 = vector.extract_strided_slice %181 {offsets = [0, 16], sizes = [8, 8], strides = [1, 1]} : vector<8x32xf32> to vector<8x8xf32>
      %185 = vector.extract_strided_slice %181 {offsets = [0, 24], sizes = [8, 8], strides = [1, 1]} : vector<8x32xf32> to vector<8x8xf32>
      %186 = vector.shape_cast %182 : vector<8x8xf32> to vector<1x8x8xf32>
      %187 = vector.shape_cast %183 : vector<8x8xf32> to vector<1x8x8xf32>
      %188 = vector.shape_cast %184 : vector<8x8xf32> to vector<1x8x8xf32>
      %189 = vector.shape_cast %185 : vector<8x8xf32> to vector<1x8x8xf32>
      %190 = tpu.concatenate %186, %187, %188, %189 in 0 : vector<1x8x8xf32>, vector<1x8x8xf32>, vector<1x8x8xf32>, vector<1x8x8xf32> -> vector<4x8x8xf32>
      %191 = arith.truncf %190 : vector<4x8x8xf32> to vector<4x8x8xbf16>
      %c0_73 = arith.constant 0 : index
      %c0_74 = arith.constant 0 : index
      %c0_75 = arith.constant 0 : index
      %192 = vector.load %arg17[%c0_73, %c0_74, %c0_75] : memref<4x8x8xbf16, #tpu.memory_space<vmem>>, vector<4x8x8xbf16>
      tpu.vector_store %arg17[%c0_73, %c0_74, %c0_75], %191 {strides = array<i32>} : memref<4x8x8xbf16, #tpu.memory_space<vmem>>, vector<4x8x8xbf16>,
    } else {
    }
    %c8_i32 = arith.constant 8 : i32
    %3 = arith.muli %arg1, %c8_i32 : i32
    %4 = tpu.assume_multiple %3, 8 : i32
    %c0 = arith.constant 0 : index
    %5 = arith.index_cast %4 : i32 to index
    %c0_1 = arith.constant 0 : index
    %6 = vector.load %arg2[%c0, %5, %c0_1] : memref<1x8x32xf32, #tpu.memory_space<vmem>>, vector<1x8x32xf32>
    %7 = vector.shape_cast %6 : vector<1x8x32xf32> to vector<8x32xf32>
    %c0_2 = arith.constant 0 : index
    %c0_3 = arith.constant 0 : index
    %8 = vector.load %arg3[%c0_2, %c0_3] : memref<1x32xf32, #tpu.memory_space<vmem>>, vector<1x32xf32>
    %9 = vector.shape_cast %8 : vector<1x32xf32> to vector<32xf32>
    %c0_4 = arith.constant 0 : index
    %c0_5 = arith.constant 0 : index
    %10 = vector.load %arg4[%c0_4, %c0_5] : memref<1x32xf32, #tpu.memory_space<vmem>>, vector<1x32xf32>
    %11 = vector.shape_cast %10 : vector<1x32xf32> to vector<32xf32>
    %cst = arith.constant dense<0.000000e+00> : vector<8xf32>
    %12 = vector.multi_reduction <add>, %7, %cst [1] : vector<8x32xf32> to vector<8xf32>
    %13 = vector.shape_cast %12 : vector<8xf32> to vector<8x1xf32>
    %cst_6 = arith.constant 3.200000e+01 : f32
    %14 = vector.broadcast %cst_6 : f32 to vector<8x1xf32>
    %15 = arith.divf %13, %14 : vector<8x1xf32>
    %16 = vector.broadcast %15 : vector<8x1xf32> to vector<8x32xf32>
    %17 = arith.subf %7, %16 : vector<8x32xf32>
    %18 = vector.broadcast %15 : vector<8x1xf32> to vector<8x32xf32>
    %19 = arith.subf %7, %18 : vector<8x32xf32>
    %20 = arith.mulf %17, %19 : vector<8x32xf32>
    %cst_7 = arith.constant dense<0.000000e+00> : vector<8xf32>
    %21 = vector.multi_reduction <add>, %20, %cst_7 [1] : vector<8x32xf32> to vector<8xf32>
    %22 = vector.shape_cast %21 : vector<8xf32> to vector<8x1xf32>
    %cst_8 = arith.constant 3.200000e+01 : f32
    %23 = vector.broadcast %cst_8 : f32 to vector<8x1xf32>
    %24 = arith.divf %22, %23 : vector<8x1xf32>
    %25 = vector.broadcast %15 : vector<8x1xf32> to vector<8x32xf32>
    %26 = arith.subf %7, %25 : vector<8x32xf32>
    %cst_9 = arith.constant 9.99999974E-6 : f32
    %27 = vector.broadcast %cst_9 : f32 to vector<8x1xf32>
    %28 = arith.addf %24, %27 : vector<8x1xf32>
    %29 = math.rsqrt %28 : vector<8x1xf32>
    %30 = vector.broadcast %29 : vector<8x1xf32> to vector<8x32xf32>
    %31 = arith.mulf %26, %30 : vector<8x32xf32>
    %32 = vector.shape_cast %9 : vector<32xf32> to vector<1x32xf32>
    %33 = vector.broadcast %32 : vector<1x32xf32> to vector<8x32xf32>
    %34 = arith.mulf %31, %33 : vector<8x32xf32>
    %35 = vector.shape_cast %11 : vector<32xf32> to vector<1x32xf32>
    %36 = vector.broadcast %35 : vector<1x32xf32> to vector<8x32xf32>
    %37 = arith.addf %34, %36 : vector<8x32xf32>
    %38 = arith.truncf %37 : vector<8x32xf32> to vector<8x32xbf16>
    %c0_10 = arith.constant 0 : index
    %c0_11 = arith.constant 0 : index
    %39 = vector.load %arg5[%c0_10, %c0_11] : memref<32x32xbf16, #tpu.memory_space<vmem>>, vector<32x32xbf16>
    %cst_12 = arith.constant dense<0.000000e+00> : vector<8x32xf32>
    %40 = tpu.matmul %38, %39, %cst_12 {dimension_numbers = #tpu.dot_dimension_numbers<[1], [0], [0], [1], [0, 0, 1, 1], [], []>} : vector<8x32xbf16>, vector<32x32xbf16>, vector<8x32xf32> -> vector<8x32xf32>
    %41 = vector.extract_strided_slice %40 {offsets = [0, 0], sizes = [8, 8], strides = [1, 1]} : vector<8x32xf32> to vector<8x8xf32>
    %42 = vector.extract_strided_slice %40 {offsets = [0, 8], sizes = [8, 8], strides = [1, 1]} : vector<8x32xf32> to vector<8x8xf32>
    %43 = vector.extract_strided_slice %40 {offsets = [0, 16], sizes = [8, 8], strides = [1, 1]} : vector<8x32xf32> to vector<8x8xf32>
    %44 = vector.extract_strided_slice %40 {offsets = [0, 24], sizes = [8, 8], strides = [1, 1]} : vector<8x32xf32> to vector<8x8xf32>
    %45 = vector.shape_cast %41 : vector<8x8xf32> to vector<1x8x8xf32>
    %46 = vector.shape_cast %42 : vector<8x8xf32> to vector<1x8x8xf32>
    %47 = vector.shape_cast %43 : vector<8x8xf32> to vector<1x8x8xf32>
    %48 = vector.shape_cast %44 : vector<8x8xf32> to vector<1x8x8xf32>
    %49 = tpu.concatenate %45, %46, %47, %48 in 0 : vector<1x8x8xf32>, vector<1x8x8xf32>, vector<1x8x8xf32>, vector<1x8x8xf32> -> vector<4x8x8xf32>
    %50 = arith.truncf %49 : vector<4x8x8xf32> to vector<4x8x8xbf16>
    %c0_13 = arith.constant 0 : index
    %c0_14 = arith.constant 0 : index
    %c0_15 = arith.constant 0 : index
    %51 = vector.load %arg16[%c0_13, %c0_14, %c0_15] : memref<4x8x8xbf16, #tpu.memory_space<vmem>>, vector<4x8x8xbf16>
    "tpu.trace_start"() <{level = 10 : i32, message = "hqd,hkd->hqk"}> : () -> ()
    %cst_16 = arith.constant dense<0.000000e+00> : vector<4x8x8xf32>
    %52 = tpu.matmul %50, %51, %cst_16 {dimension_numbers = #tpu.dot_dimension_numbers<[2], [2], [1], [1], [0, 0, 0, 1, 1, 1], [0], [0]>} : vector<4x8x8xbf16>, vector<4x8x8xbf16>, vector<4x8x8xf32> -> vector<4x8x8xf32>
    "tpu.trace_stop"() : () -> ()
    %cst_17 = arith.constant dense<0xFF800000> : vector<4x8xf32>
    %53 = vector.multi_reduction <maximumf>, %52, %cst_17 [2] : vector<4x8x8xf32> to vector<4x8xf32>
    %54 = vector.shape_cast %53 : vector<4x8xf32> to vector<4x8x1xf32>
    %55 = vector.broadcast %54 : vector<4x8x1xf32> to vector<4x8x8xf32>
    %56 = arith.subf %52, %55 : vector<4x8x8xf32>
    %57 = math.exp %56 : vector<4x8x8xf32>
    %cst_18 = arith.constant dense<0.000000e+00> : vector<4x8xf32>
    %58 = vector.multi_reduction <add>, %57, %cst_18 [2] : vector<4x8x8xf32> to vector<4x8xf32>
    %59 = vector.shape_cast %58 : vector<4x8xf32> to vector<4x8x1xf32>
    %60 = tpu.reciprocal %59 {approx = true} : vector<4x8x1xf32> -> vector<4x8x1xf32>
    %61 = vector.broadcast %60 : vector<4x8x1xf32> to vector<4x8x8xf32>
    %62 = arith.mulf %57, %61 : vector<4x8x8xf32>
    %63 = arith.truncf %62 : vector<4x8x8xf32> to vector<4x8x8xbf16>
    %c0_19 = arith.constant 0 : index
    %c0_20 = arith.constant 0 : index
    %c0_21 = arith.constant 0 : index
    %64 = vector.load %arg17[%c0_19, %c0_20, %c0_21] : memref<4x8x8xbf16, #tpu.memory_space<vmem>>, vector<4x8x8xbf16>
    "tpu.trace_start"() <{level = 10 : i32, message = "hqk,hkd->hqd"}> : () -> ()
    %cst_22 = arith.constant dense<0.000000e+00> : vector<4x8x8xf32>
    %65 = tpu.matmul %63, %64, %cst_22 {dimension_numbers = #tpu.dot_dimension_numbers<[2], [1], [1], [2], [0, 0, 0, 1, 1, 2], [0], [0]>} : vector<4x8x8xbf16>, vector<4x8x8xbf16>, vector<4x8x8xf32> -> vector<4x8x8xf32>
    "tpu.trace_stop"() : () -> ()
    %66 = arith.truncf %65 : vector<4x8x8xf32> to vector<4x8x8xbf16>
    %c0_23 = arith.constant 0 : index
    %c0_24 = arith.constant 0 : index
    %c0_25 = arith.constant 0 : index
    %67 = vector.load %arg7[%c0_23, %c0_24, %c0_25] : memref<4x8x32xbf16, #tpu.memory_space<vmem>>, vector<4x8x32xbf16>
    "tpu.trace_start"() <{level = 10 : i32, message = "hqd,hdo->hqo"}> : () -> ()
    %cst_26 = arith.constant dense<0.000000e+00> : vector<4x8x32xf32>
    %68 = tpu.matmul %66, %67, %cst_26 {dimension_numbers = #tpu.dot_dimension_numbers<[2], [1], [1], [2], [0, 0, 0, 1, 1, 2], [0], [0]>} : vector<4x8x8xbf16>, vector<4x8x32xbf16>, vector<4x8x32xf32> -> vector<4x8x32xf32>
    "tpu.trace_stop"() : () -> ()
    %cst_27 = arith.constant dense<0.000000e+00> : vector<8x32xf32>
    %69 = vector.multi_reduction <add>, %68, %cst_27 [0] : vector<4x8x32xf32> to vector<8x32xf32>
    %c0_28 = arith.constant 0 : index
    %c0_29 = arith.constant 0 : index
    %70 = vector.load %arg8[%c0_28, %c0_29] : memref<1x32xf32, #tpu.memory_space<vmem>>, vector<1x32xf32>
    %71 = vector.shape_cast %70 : vector<1x32xf32> to vector<32xf32>
    %72 = vector.shape_cast %71 : vector<32xf32> to vector<1x32xf32>
    %73 = vector.broadcast %72 : vector<1x32xf32> to vector<8x32xf32>
    %74 = arith.addf %69, %73 : vector<8x32xf32>
    %75 = arith.addf %7, %74 : vector<8x32xf32>
    %c0_30 = arith.constant 0 : index
    %c0_31 = arith.constant 0 : index
    %76 = vector.load %arg9[%c0_30, %c0_31] : memref<1x32xf32, #tpu.memory_space<vmem>>, vector<1x32xf32>
    %77 = vector.shape_cast %76 : vector<1x32xf32> to vector<32xf32>
    %c0_32 = arith.constant 0 : index
    %c0_33 = arith.constant 0 : index
    %78 = vector.load %arg10[%c0_32, %c0_33] : memref<1x32xf32, #tpu.memory_space<vmem>>, vector<1x32xf32>
    %79 = vector.shape_cast %78 : vector<1x32xf32> to vector<32xf32>
    %cst_34 = arith.constant dense<0.000000e+00> : vector<8xf32>
    %80 = vector.multi_reduction <add>, %75, %cst_34 [1] : vector<8x32xf32> to vector<8xf32>
    %81 = vector.shape_cast %80 : vector<8xf32> to vector<8x1xf32>
    %cst_35 = arith.constant 3.200000e+01 : f32
    %82 = vector.broadcast %cst_35 : f32 to vector<8x1xf32>
    %83 = arith.divf %81, %82 : vector<8x1xf32>
    %84 = vector.broadcast %83 : vector<8x1xf32> to vector<8x32xf32>
    %85 = arith.subf %75, %84 : vector<8x32xf32>
    %86 = vector.broadcast %83 : vector<8x1xf32> to vector<8x32xf32>
    %87 = arith.subf %75, %86 : vector<8x32xf32>
    %88 = arith.mulf %85, %87 : vector<8x32xf32>
    %cst_36 = arith.constant dense<0.000000e+00> : vector<8xf32>
    %89 = vector.multi_reduction <add>, %88, %cst_36 [1] : vector<8x32xf32> to vector<8xf32>
    %90 = vector.shape_cast %89 : vector<8xf32> to vector<8x1xf32>
    %cst_37 = arith.constant 3.200000e+01 : f32
    %91 = vector.broadcast %cst_37 : f32 to vector<8x1xf32>
    %92 = arith.divf %90, %91 : vector<8x1xf32>
    %93 = vector.broadcast %83 : vector<8x1xf32> to vector<8x32xf32>
    %94 = arith.subf %75, %93 : vector<8x32xf32>
    %cst_38 = arith.constant 9.99999974E-6 : f32
    %95 = vector.broadcast %cst_38 : f32 to vector<8x1xf32>
    %96 = arith.addf %92, %95 : vector<8x1xf32>
    %97 = math.rsqrt %96 : vector<8x1xf32>
    %98 = vector.broadcast %97 : vector<8x1xf32> to vector<8x32xf32>
    %99 = arith.mulf %94, %98 : vector<8x32xf32>
    %100 = vector.shape_cast %77 : vector<32xf32> to vector<1x32xf32>
    %101 = vector.broadcast %100 : vector<1x32xf32> to vector<8x32xf32>
    %102 = arith.mulf %99, %101 : vector<8x32xf32>
    %103 = vector.shape_cast %79 : vector<32xf32> to vector<1x32xf32>
    %104 = vector.broadcast %103 : vector<1x32xf32> to vector<8x32xf32>
    %105 = arith.addf %102, %104 : vector<8x32xf32>
    %106 = arith.truncf %105 : vector<8x32xf32> to vector<8x32xbf16>
    %c0_39 = arith.constant 0 : index
    %c0_40 = arith.constant 0 : index
    %107 = vector.load %arg11[%c0_39, %c0_40] : memref<32x64xbf16, #tpu.memory_space<vmem>>, vector<32x64xbf16>
    %cst_41 = arith.constant dense<0.000000e+00> : vector<8x64xf32>
    %108 = tpu.matmul %106, %107, %cst_41 {dimension_numbers = #tpu.dot_dimension_numbers<[1], [0], [0], [1], [0, 0, 1, 1], [], []>} : vector<8x32xbf16>, vector<32x64xbf16>, vector<8x64xf32> -> vector<8x64xf32>
    %c0_42 = arith.constant 0 : index
    %c0_43 = arith.constant 0 : index
    %109 = vector.load %arg12[%c0_42, %c0_43] : memref<1x64xf32, #tpu.memory_space<vmem>>, vector<1x64xf32>
    %110 = vector.shape_cast %109 : vector<1x64xf32> to vector<64xf32>
    %111 = vector.shape_cast %110 : vector<64xf32> to vector<1x64xf32>
    %112 = vector.broadcast %111 : vector<1x64xf32> to vector<8x64xf32>
    %113 = arith.addf %108, %112 : vector<8x64xf32>
    %cst_44 = arith.constant 5.000000e-01 : f32
    %114 = vector.broadcast %cst_44 : f32 to vector<8x64xf32>
    %115 = arith.mulf %114, %113 : vector<8x64xf32>
    %cst_45 = arith.constant 0.707106769 : f32
    %116 = vector.broadcast %cst_45 : f32 to vector<8x64xf32>
    %117 = arith.mulf %113, %116 : vector<8x64xf32>
    %118 = math.erf %117 : vector<8x64xf32>
    %cst_46 = arith.constant 1.000000e+00 : f32
    %119 = vector.broadcast %cst_46 : f32 to vector<8x64xf32>
    %120 = arith.addf %119, %118 : vector<8x64xf32>
    %121 = arith.mulf %115, %120 : vector<8x64xf32>
    %122 = arith.truncf %121 : vector<8x64xf32> to vector<8x64xbf16>
    %c0_47 = arith.constant 0 : index
    %c0_48 = arith.constant 0 : index
    %123 = vector.load %arg13[%c0_47, %c0_48] : memref<64x32xbf16, #tpu.memory_space<vmem>>, vector<64x32xbf16>
    %cst_49 = arith.constant dense<0.000000e+00> : vector<8x32xf32>
    %124 = tpu.matmul %122, %123, %cst_49 {dimension_numbers = #tpu.dot_dimension_numbers<[1], [0], [0], [1], [0, 0, 1, 1], [], []>} : vector<8x64xbf16>, vector<64x32xbf16>, vector<8x32xf32> -> vector<8x32xf32>
    %c0_50 = arith.constant 0 : index
    %c0_51 = arith.constant 0 : index
    %125 = vector.load %arg14[%c0_50, %c0_51] : memref<1x32xf32, #tpu.memory_space<vmem>>, vector<1x32xf32>
    %126 = vector.shape_cast %125 : vector<1x32xf32> to vector<32xf32>
    %127 = vector.shape_cast %126 : vector<32xf32> to vector<1x32xf32>
    %128 = vector.broadcast %127 : vector<1x32xf32> to vector<8x32xf32>
    %129 = arith.addf %124, %128 : vector<8x32xf32>
    %130 = arith.addf %75, %129 : vector<8x32xf32>
    %c0_52 = arith.constant 0 : index
    %c0_53 = arith.constant 0 : index
    %c0_54 = arith.constant 0 : index
    %131 = vector.load %arg15[%c0_52, %c0_53, %c0_54] : memref<1x8x32xf32, #tpu.memory_space<vmem>>, vector<1x8x32xf32>
    %132 = vector.shape_cast %131 : vector<1x8x32xf32> to vector<8x32xf32>
    %133 = vector.shape_cast %130 : vector<8x32xf32> to vector<1x8x32xf32>
    tpu.vector_store %arg15[%c0_52, %c0_53, %c0_54], %133 {strides = array<i32>} : memref<1x8x32xf32, #tpu.memory_space<vmem>>, vector<1x8x32xf32>,
    return
  }
  func.func @transform_0(%arg0: i32, %arg1: i32) -> (i32, i32, i32) {
    %c0_i32 = arith.constant 0 : i32
    %c0_i32_0 = arith.constant 0 : i32
    %c0_i32_1 = arith.constant 0 : i32
    return %arg0, %c0_i32, %c0_i32_0 : i32, i32, i32
  }
  func.func @transform_1(%arg0: i32, %arg1: i32) -> (i32, i32) {
    %c0_i32 = arith.constant 0 : i32
    %c0_i32_0 = arith.constant 0 : i32
    %c0_i32_1 = arith.constant 0 : i32
    return %c0_i32, %c0_i32_0 : i32, i32
  }
  func.func @transform_2(%arg0: i32, %arg1: i32) -> (i32, i32) {
    %c0_i32 = arith.constant 0 : i32
    %c0_i32_0 = arith.constant 0 : i32
    %c0_i32_1 = arith.constant 0 : i32
    return %c0_i32, %c0_i32_0 : i32, i32
  }
  func.func @transform_3(%arg0: i32, %arg1: i32) -> (i32, i32) {
    %c0_i32 = arith.constant 0 : i32
    %c0_i32_0 = arith.constant 0 : i32
    %c0_i32_1 = arith.constant 0 : i32
    return %c0_i32, %c0_i32_0 : i32, i32
  }
  func.func @transform_4(%arg0: i32, %arg1: i32) -> (i32, i32) {
    %c0_i32 = arith.constant 0 : i32
    %c0_i32_0 = arith.constant 0 : i32
    %c0_i32_1 = arith.constant 0 : i32
    return %c0_i32, %c0_i32_0 : i32, i32
  }
  func.func @transform_5(%arg0: i32, %arg1: i32) -> (i32, i32, i32) {
    %c0_i32 = arith.constant 0 : i32
    %c0_i32_0 = arith.constant 0 : i32
    %c0_i32_1 = arith.constant 0 : i32
    %c0_i32_2 = arith.constant 0 : i32
    return %c0_i32, %c0_i32_0, %c0_i32_1 : i32, i32, i32
  }
  func.func @transform_6(%arg0: i32, %arg1: i32) -> (i32, i32) {
    %c0_i32 = arith.constant 0 : i32
    %c0_i32_0 = arith.constant 0 : i32
    %c0_i32_1 = arith.constant 0 : i32
    return %c0_i32, %c0_i32_0 : i32, i32
  }
  func.func @transform_7(%arg0: i32, %arg1: i32) -> (i32, i32) {
    %c0_i32 = arith.constant 0 : i32
    %c0_i32_0 = arith.constant 0 : i32
    %c0_i32_1 = arith.constant 0 : i32
    return %c0_i32, %c0_i32_0 : i32, i32
  }
  func.func @transform_8(%arg0: i32, %arg1: i32) -> (i32, i32) {
    %c0_i32 = arith.constant 0 : i32
    %c0_i32_0 = arith.constant 0 : i32
    %c0_i32_1 = arith.constant 0 : i32
    return %c0_i32, %c0_i32_0 : i32, i32
  }
  func.func @transform_9(%arg0: i32, %arg1: i32) -> (i32, i32) {
    %c0_i32 = arith.constant 0 : i32
    %c0_i32_0 = arith.constant 0 : i32
    %c0_i32_1 = arith.constant 0 : i32
    return %c0_i32, %c0_i32_0 : i32, i32
  }
  func.func @transform_10(%arg0: i32, %arg1: i32) -> (i32, i32) {
    %c0_i32 = arith.constant 0 : i32
    %c0_i32_0 = arith.constant 0 : i32
    %c0_i32_1 = arith.constant 0 : i32
    return %c0_i32, %c0_i32_0 : i32, i32
  }
  func.func @transform_11(%arg0: i32, %arg1: i32) -> (i32, i32) {
    %c0_i32 = arith.constant 0 : i32
    %c0_i32_0 = arith.constant 0 : i32
    %c0_i32_1 = arith.constant 0 : i32
    return %c0_i32, %c0_i32_0 : i32, i32
  }
  func.func @transform_12(%arg0: i32, %arg1: i32) -> (i32, i32) {
    %c0_i32 = arith.constant 0 : i32
    %c0_i32_0 = arith.constant 0 : i32
    %c0_i32_1 = arith.constant 0 : i32
    return %c0_i32, %c0_i32_0 : i32, i32
  }
  func.func @transform_13(%arg0: i32, %arg1: i32) -> (i32, i32, i32) {
    %c0_i32 = arith.constant 0 : i32
    %c0_i32_0 = arith.constant 0 : i32
    return %arg0, %arg1, %c0_i32 : i32, i32, i32
  }
}

module attributes {stable_mosaic.version = 11 : i64} {
  func.func @layer_kernel(%arg0: i32, %arg1: i32, %arg2: memref<1x8x32xf32, #tpu.memory_space<vmem>>, %arg3: memref<1x32xf32, #tpu.memory_space<vmem>>, %arg4: memref<1x32xf32, #tpu.memory_space<vmem>>, %arg5: memref<32x32xbf16, #tpu.memory_space<vmem>>, %arg6: memref<32x64xbf16, #tpu.memory_space<vmem>>, %arg7: memref<4x8x32xbf16, #tpu.memory_space<vmem>>, %arg8: memref<1x32xf32, #tpu.memory_space<vmem>>, %arg9: memref<1x32xf32, #tpu.memory_space<vmem>>, %arg10: memref<1x32xf32, #tpu.memory_space<vmem>>, %arg11: memref<32x64xbf16, #tpu.memory_space<vmem>>, %arg12: memref<1x64xf32, #tpu.memory_space<vmem>>, %arg13: memref<64x32xbf16, #tpu.memory_space<vmem>>, %arg14: memref<1x32xf32, #tpu.memory_space<vmem>>, %arg15: memref<1x8x32xf32, #tpu.memory_space<vmem>>, %arg16: memref<4x8x8xbf16, #tpu.memory_space<vmem>>, %arg17: memref<4x8x8xbf16, #tpu.memory_space<vmem>>) attributes {dimension_semantics = [#tpu.dimension_semantics<parallel>, #tpu.dimension_semantics<arbitrary>], iteration_bounds = array<i64: 2, 1>, scalar_prefetch = 0 : i64, scratch_operands = 2 : i64, tpu.core_type = #tpu.core_type<tc>, window_params = [{transform_indices = @transform_0, window_bounds = array<i64: 1, 8, 32>}, {pipeline_mode = #tpu.pipeline_mode<synchronous>, transform_indices = @transform_1, window_bounds = array<i64: 1, 32>}, {pipeline_mode = #tpu.pipeline_mode<synchronous>, transform_indices = @transform_2, window_bounds = array<i64: 1, 32>}, {pipeline_mode = #tpu.pipeline_mode<synchronous>, transform_indices = @transform_3, window_bounds = array<i64: 32, 32>}, {pipeline_mode = #tpu.pipeline_mode<synchronous>, transform_indices = @transform_4, window_bounds = array<i64: 32, 64>}, {pipeline_mode = #tpu.pipeline_mode<synchronous>, transform_indices = @transform_5, window_bounds = array<i64: 4, 8, 32>}, {pipeline_mode = #tpu.pipeline_mode<synchronous>, transform_indices = @transform_6, window_bounds = array<i64: 1, 32>}, {pipeline_mode = #tpu.pipeline_mode<synchronous>, transform_indices = @transform_7, window_bounds = array<i64: 1, 32>}, {pipeline_mode = #tpu.pipeline_mode<synchronous>, transform_indices = @transform_8, window_bounds = array<i64: 1, 32>}, {pipeline_mode = #tpu.pipeline_mode<synchronous>, transform_indices = @transform_9, window_bounds = array<i64: 32, 64>}, {pipeline_mode = #tpu.pipeline_mode<synchronous>, transform_indices = @transform_10, window_bounds = array<i64: 1, 64>}, {pipeline_mode = #tpu.pipeline_mode<synchronous>, transform_indices = @transform_11, window_bounds = array<i64: 64, 32>}, {pipeline_mode = #tpu.pipeline_mode<synchronous>, transform_indices = @transform_12, window_bounds = array<i64: 1, 32>}, {transform_indices = @transform_13, window_bounds = array<i64: 1, 8, 32>}]} {
    %c0_i32 = arith.constant 0 : i32
    %0 = arith.cmpi eq, %arg1, %c0_i32 : i32
    %1 = arith.extui %0 : i1 to i32
    %c0_i32_0 = arith.constant 0 : i32
    %2 = arith.cmpi ne, %1, %c0_i32_0 : i32
    scf.if %2 {
      %c0_55 = arith.constant 0 : index
      %c0_56 = arith.constant 0 : index
      %c0_57 = arith.constant 0 : index
      %134 = vector.load %arg2[%c0_55, %c0_56, %c0_57] : memref<1x8x32xf32, #tpu.memory_space<vmem>>, vector<1x8x32xf32>
      %135 = vector.shape_cast %134 : vector<1x8x32xf32> to vector<8x32xf32>
      %c0_58 = arith.constant 0 : index
      %c0_59 = arith.constant 0 : index
      %136 = vector.load %arg3[%c0_58, %c0_59] : memref<1x32xf32, #tpu.memory_space<vmem>>, vector<1x32xf32>
      %137 = vector.shape_cast %136 : vector<1x32xf32> to vector<32xf32>
      %c0_60 = arith.constant 0 : index
      %c0_61 = arith.constant 0 : index
      %138 = vector.load %arg4[%c0_60, %c0_61] : memref<1x32xf32, #tpu.memory_space<vmem>>, vector<1x32xf32>
      %139 = vector.shape_cast %138 : vector<1x32xf32> to vector<32xf32>
      %cst_62 = arith.constant dense<0.000000e+00> : vector<8xf32>
      %140 = vector.multi_reduction <add>, %135, %cst_62 [1] : vector<8x32xf32> to vector<8xf32>
      %141 = vector.shape_cast %140 : vector<8xf32> to vector<8x1xf32>
      %cst_63 = arith.constant 3.200000e+01 : f32
      %142 = vector.broadcast %cst_63 : f32 to vector<8x1xf32>
      %143 = arith.divf %141, %142 : vector<8x1xf32>
      %144 = vector.broadcast %143 : vector<8x1xf32> to vector<8x32xf32>
      %145 = arith.subf %135, %144 : vector<8x32xf32>
      %146 = vector.broadcast %143 : vector<8x1xf32> to vector<8x32xf32>
      %147 = arith.subf %135, %146 : vector<8x32xf32>
      %148 = arith.mulf %145, %147 : vector<8x32xf32>
      %cst_64 = arith.constant dense<0.000000e+00> : vector<8xf32>
      %149 = vector.multi_reduction <add>, %148, %cst_64 [1] : vector<8x32xf32> to vector<8xf32>
      %150 = vector.shape_cast %149 : vector<8xf32> to vector<8x1xf32>
      %cst_65 = arith.constant 3.200000e+01 : f32
      %151 = vector.broadcast %cst_65 : f32 to vector<8x1xf32>
      %152 = arith.divf %150, %151 : vector<8x1xf32>
      %153 = vector.broadcast %143 : vector<8x1xf32> to vector<8x32xf32>
      %154 = arith.subf %135, %153 : vector<8x32xf32>
      %cst_66 = arith.constant 9.99999974E-6 : f32
      %155 = vector.broadcast %cst_66 : f32 to vector<8x1xf32>
      %156 = arith.addf %152, %155 : vector<8x1xf32>
      %157 = math.rsqrt %156 : vector<8x1xf32>
      %158 = vector.broadcast %157 : vector<8x1xf32> to vector<8x32xf32>
      %159 = arith.mulf %154, %158 : vector<8x32xf32>
      %160 = vector.shape_cast %137 : vector<32xf32> to vector<1x32xf32>
      %161 = vector.broadcast %160 : vector<1x32xf32> to vector<8x32xf32>
      %162 = arith.mulf %159, %161 : vector<8x32xf32>
      %163 = vector.shape_cast %139 : vector<32xf32> to vector<1x32xf32>
      %164 = vector.broadcast %163 : vector<1x32xf32> to vector<8x32xf32>
      %165 = arith.addf %162, %164 : vector<8x32xf32>
      %166 = arith.truncf %165 : vector<8x32xf32> to vector<8x32xbf16>
      %c0_67 = arith.constant 0 : index
      %c0_68 = arith.constant 0 : index
      %167 = vector.load %arg6[%c0_67, %c0_68] : memref<32x64xbf16, #tpu.memory_space<vmem>>, vector<32x64xbf16>
      %cst_69 = arith.constant dense<0.000000e+00> : vector<8x64xf32>
      %168 = tpu.matmul %166, %167, %cst_69 {dimension_numbers = #tpu.dot_dimension_numbers<[1], [0], [0], [1], [0, 0, 1, 1], [], []>} : vector<8x32xbf16>, vector<32x64xbf16>, vector<8x64xf32> -> vector<8x64xf32>
      %169 = vector.extract_strided_slice %168 {offsets = [0, 0], sizes = [8, 32], strides = [1, 1]} : vector<8x64xf32> to vector<8x32xf32>
      %170 = vector.extract_strided_slice %169 {offsets = [0, 0], sizes = [8, 8], strides = [1, 1]} : vector<8x32xf32> to vector<8x8xf32>
      %171 = vector.extract_strided_slice %169 {offsets = [0, 8], sizes = [8, 8], strides = [1, 1]} : vector<8x32xf32> to vector<8x8xf32>
      %172 = vector.extract_strided_slice %169 {offsets = [0, 16], sizes = [8, 8], strides = [1, 1]} : vector<8x32xf32> to vector<8x8xf32>
      %173 = vector.extract_strided_slice %169 {offsets = [0, 24], sizes = [8, 8], strides = [1, 1]} : vector<8x32xf32> to vector<8x8xf32>
      %174 = vector.shape_cast %170 : vector<8x8xf32> to vector<1x8x8xf32>
      %175 = vector.shape_cast %171 : vector<8x8xf32> to vector<1x8x8xf32>
      %176 = vector.shape_cast %172 : vector<8x8xf32> to vector<1x8x8xf32>
      %177 = vector.shape_cast %173 : vector<8x8xf32> to vector<1x8x8xf32>
      %178 = tpu.concatenate %174, %175, %176, %177 in 0 : vector<1x8x8xf32>, vector<1x8x8xf32>, vector<1x8x8xf32>, vector<1x8x8xf32> -> vector<4x8x8xf32>
      %179 = arith.truncf %178 : vector<4x8x8xf32> to vector<4x8x8xbf16>
      %c0_70 = arith.constant 0 : index
      %c0_71 = arith.constant 0 : index
      %c0_72 = arith.constant 0 : index
      %180 = vector.load %arg16[%c0_70, %c0_71, %c0_72] : memref<4x8x8xbf16, #tpu.memory_space<vmem>>, vector<4x8x8xbf16>
      tpu.vector_store %arg16[%c0_70, %c0_71, %c0_72], %179 {strides = array<i32>} : memref<4x8x8xbf16, #tpu.memory_space<vmem>>, vector<4x8x8xbf16>,
      %181 = vector.extract_strided_slice %168 {offsets = [0, 32], sizes = [8, 32], strides = [1, 1]} : vector<8x64xf32> to vector<8x32xf32>
      %182 = vector.extract_strided_slice %181 {offsets = [0, 0], sizes = [8, 8], strides = [1, 1]} : vector<8x32xf32> to vector<8x8xf32>
      %183 = vector.extract_strided_slice %181 {offsets = [0, 8], sizes = [8, 8], strides = [1, 1]} : vector<8x32xf32> to vector<8x8xf32>
      %184 = vector.extract_strided_slice %181 {offsets = [0, 16], sizes = [8, 8], strides = [1, 1]} : vector<8x32xf32> to vector<8x8xf32>
      %185 = vector.extract_strided_slice %181 {offsets = [0, 24], sizes = [8, 8], strides = [1, 1]} : vector<8x32xf32> to vector<8x8xf32>
      %186 = vector.shape_cast %182 : vector<8x8xf32> to vector<1x8x8xf32>
      %187 = vector.shape_cast %183 : vector<8x8xf32> to vector<1x8x8xf32>
      %188 = vector.shape_cast %184 : vector<8x8xf32> to vector<1x8x8xf32>
      %189 = vector.shape_cast %185 : vector<8x8xf32> to vector<1x8x8xf32>
      %190 = tpu.concatenate %186, %187, %188, %189 in 0 : vector<1x8x8xf32>, vector<1x8x8xf32>, vector<1x8x8xf32>, vector<1x8x8xf32> -> vector<4x8x8xf32>
      %191 = arith.truncf %190 : vector<4x8x8xf32> to vector<4x8x8xbf16>
      %c0_73 = arith.constant 0 : index
      %c0_74 = arith.constant 0 : index
      %c0_75 = arith.constant 0 : index
      %192 = vector.load %arg17[%c0_73, %c0_74, %c0_75] : memref<4x8x8xbf16, #tpu.memory_space<vmem>>, vector<4x8x8xbf16>
      tpu.vector_store %arg17[%c0_73, %c0_74, %c0_75], %191 {strides = array<i32>} : memref<4x8x8xbf16, #tpu.memory_space<vmem>>, vector<4x8x8xbf16>,
    } else {
    }
    %c8_i32 = arith.constant 8 : i32
    %3 = arith.muli %arg1, %c8_i32 : i32
    %4 = tpu.assume_multiple %3, 8 : i32
    %c0 = arith.constant 0 : index
    %5 = arith.index_cast %4 : i32 to index
    %c0_1 = arith.constant 0 : index
    %6 = vector.load %arg2[%c0, %5, %c0_1] : memref<1x8x32xf32, #tpu.memory_space<vmem>>, vector<1x8x32xf32>
    %7 = vector.shape_cast %6 : vector<1x8x32xf32> to vector<8x32xf32>
    %c0_2 = arith.constant 0 : index
    %c0_3 = arith.constant 0 : index
    %8 = vector.load %arg3[%c0_2, %c0_3] : memref<1x32xf32, #tpu.memory_space<vmem>>, vector<1x32xf32>
    %9 = vector.shape_cast %8 : vector<1x32xf32> to vector<32xf32>
    %c0_4 = arith.constant 0 : index
    %c0_5 = arith.constant 0 : index
    %10 = vector.load %arg4[%c0_4, %c0_5] : memref<1x32xf32, #tpu.memory_space<vmem>>, vector<1x32xf32>
    %11 = vector.shape_cast %10 : vector<1x32xf32> to vector<32xf32>
    %cst = arith.constant dense<0.000000e+00> : vector<8xf32>
    %12 = vector.multi_reduction <add>, %7, %cst [1] : vector<8x32xf32> to vector<8xf32>
    %13 = vector.shape_cast %12 : vector<8xf32> to vector<8x1xf32>
    %cst_6 = arith.constant 3.200000e+01 : f32
    %14 = vector.broadcast %cst_6 : f32 to vector<8x1xf32>
    %15 = arith.divf %13, %14 : vector<8x1xf32>
    %16 = vector.broadcast %15 : vector<8x1xf32> to vector<8x32xf32>
    %17 = arith.subf %7, %16 : vector<8x32xf32>
    %18 = vector.broadcast %15 : vector<8x1xf32> to vector<8x32xf32>
    %19 = arith.subf %7, %18 : vector<8x32xf32>
    %20 = arith.mulf %17, %19 : vector<8x32xf32>
    %cst_7 = arith.constant dense<0.000000e+00> : vector<8xf32>
    %21 = vector.multi_reduction <add>, %20, %cst_7 [1] : vector<8x32xf32> to vector<8xf32>
    %22 = vector.shape_cast %21 : vector<8xf32> to vector<8x1xf32>
    %cst_8 = arith.constant 3.200000e+01 : f32
    %23 = vector.broadcast %cst_8 : f32 to vector<8x1xf32>
    %24 = arith.divf %22, %23 : vector<8x1xf32>
    %25 = vector.broadcast %15 : vector<8x1xf32> to vector<8x32xf32>
    %26 = arith.subf %7, %25 : vector<8x32xf32>
    %cst_9 = arith.constant 9.99999974E-6 : f32
    %27 = vector.broadcast %cst_9 : f32 to vector<8x1xf32>
    %28 = arith.addf %24, %27 : vector<8x1xf32>
    %29 = math.rsqrt %28 : vector<8x1xf32>
    %30 = vector.broadcast %29 : vector<8x1xf32> to vector<8x32xf32>
    %31 = arith.mulf %26, %30 : vector<8x32xf32>
    %32 = vector.shape_cast %9 : vector<32xf32> to vector<1x32xf32>
    %33 = vector.broadcast %32 : vector<1x32xf32> to vector<8x32xf32>
    %34 = arith.mulf %31, %33 : vector<8x32xf32>
    %35 = vector.shape_cast %11 : vector<32xf32> to vector<1x32xf32>
    %36 = vector.broadcast %35 : vector<1x32xf32> to vector<8x32xf32>
    %37 = arith.addf %34, %36 : vector<8x32xf32>
    %38 = arith.truncf %37 : vector<8x32xf32> to vector<8x32xbf16>
    %c0_10 = arith.constant 0 : index
    %c0_11 = arith.constant 0 : index
    %39 = vector.load %arg5[%c0_10, %c0_11] : memref<32x32xbf16, #tpu.memory_space<vmem>>, vector<32x32xbf16>
    %cst_12 = arith.constant dense<0.000000e+00> : vector<8x32xf32>
    %40 = tpu.matmul %38, %39, %cst_12 {dimension_numbers = #tpu.dot_dimension_numbers<[1], [0], [0], [1], [0, 0, 1, 1], [], []>} : vector<8x32xbf16>, vector<32x32xbf16>, vector<8x32xf32> -> vector<8x32xf32>
    %41 = vector.extract_strided_slice %40 {offsets = [0, 0], sizes = [8, 8], strides = [1, 1]} : vector<8x32xf32> to vector<8x8xf32>
    %42 = vector.extract_strided_slice %40 {offsets = [0, 8], sizes = [8, 8], strides = [1, 1]} : vector<8x32xf32> to vector<8x8xf32>
    %43 = vector.extract_strided_slice %40 {offsets = [0, 16], sizes = [8, 8], strides = [1, 1]} : vector<8x32xf32> to vector<8x8xf32>
    %44 = vector.extract_strided_slice %40 {offsets = [0, 24], sizes = [8, 8], strides = [1, 1]} : vector<8x32xf32> to vector<8x8xf32>
    %45 = vector.shape_cast %41 : vector<8x8xf32> to vector<1x8x8xf32>
    %46 = vector.shape_cast %42 : vector<8x8xf32> to vector<1x8x8xf32>
    %47 = vector.shape_cast %43 : vector<8x8xf32> to vector<1x8x8xf32>
    %48 = vector.shape_cast %44 : vector<8x8xf32> to vector<1x8x8xf32>
    %49 = tpu.concatenate %45, %46, %47, %48 in 0 : vector<1x8x8xf32>, vector<1x8x8xf32>, vector<1x8x8xf32>, vector<1x8x8xf32> -> vector<4x8x8xf32>
    %50 = arith.truncf %49 : vector<4x8x8xf32> to vector<4x8x8xbf16>
    %c0_13 = arith.constant 0 : index
    %c0_14 = arith.constant 0 : index
    %c0_15 = arith.constant 0 : index
    %51 = vector.load %arg16[%c0_13, %c0_14, %c0_15] : memref<4x8x8xbf16, #tpu.memory_space<vmem>>, vector<4x8x8xbf16>
    "tpu.trace_start"() <{level = 10 : i32, message = "hqd,hkd->hqk"}> : () -> ()
    %cst_16 = arith.constant dense<0.000000e+00> : vector<4x8x8xf32>
    %52 = tpu.matmul %50, %51, %cst_16 {dimension_numbers = #tpu.dot_dimension_numbers<[2], [2], [1], [1], [0, 0, 0, 1, 1, 1], [0], [0]>} : vector<4x8x8xbf16>, vector<4x8x8xbf16>, vector<4x8x8xf32> -> vector<4x8x8xf32>
    "tpu.trace_stop"() : () -> ()
    %cst_17 = arith.constant dense<0xFF800000> : vector<4x8xf32>
    %53 = vector.multi_reduction <maximumf>, %52, %cst_17 [2] : vector<4x8x8xf32> to vector<4x8xf32>
    %54 = vector.shape_cast %53 : vector<4x8xf32> to vector<4x8x1xf32>
    %55 = vector.broadcast %54 : vector<4x8x1xf32> to vector<4x8x8xf32>
    %56 = arith.subf %52, %55 : vector<4x8x8xf32>
    %57 = math.exp %56 : vector<4x8x8xf32>
    %cst_18 = arith.constant dense<0.000000e+00> : vector<4x8xf32>
    %58 = vector.multi_reduction <add>, %57, %cst_18 [2] : vector<4x8x8xf32> to vector<4x8xf32>
    %59 = vector.shape_cast %58 : vector<4x8xf32> to vector<4x8x1xf32>
    %60 = tpu.reciprocal %59 {approx = true} : vector<4x8x1xf32> -> vector<4x8x1xf32>
    %61 = vector.broadcast %60 : vector<4x8x1xf32> to vector<4x8x8xf32>
    %62 = arith.mulf %57, %61 : vector<4x8x8xf32>
    %63 = arith.truncf %62 : vector<4x8x8xf32> to vector<4x8x8xbf16>
    %c0_19 = arith.constant 0 : index
    %c0_20 = arith.constant 0 : index
    %c0_21 = arith.constant 0 : index
    %64 = vector.load %arg17[%c0_19, %c0_20, %c0_21] : memref<4x8x8xbf16, #tpu.memory_space<vmem>>, vector<4x8x8xbf16>
    "tpu.trace_start"() <{level = 10 : i32, message = "hqk,hkd->hqd"}> : () -> ()
    %cst_22 = arith.constant dense<0.000000e+00> : vector<4x8x8xf32>
    %65 = tpu.matmul %63, %64, %cst_22 {dimension_numbers = #tpu.dot_dimension_numbers<[2], [1], [1], [2], [0, 0, 0, 1, 1, 2], [0], [0]>} : vector<4x8x8xbf16>, vector<4x8x8xbf16>, vector<4x8x8xf32> -> vector<4x8x8xf32>
    "tpu.trace_stop"() : () -> ()
    %66 = arith.truncf %65 : vector<4x8x8xf32> to vector<4x8x8xbf16>
    %c0_23 = arith.constant 0 : index
    %c0_24 = arith.constant 0 : index
    %c0_25 = arith.constant 0 : index
    %67 = vector.load %arg7[%c0_23, %c0_24, %c0_25] : memref<4x8x32xbf16, #tpu.memory_space<vmem>>, vector<4x8x32xbf16>
    "tpu.trace_start"() <{level = 10 : i32, message = "hqd,hdo->hqo"}> : () -> ()
    %cst_26 = arith.constant dense<0.000000e+00> : vector<4x8x32xf32>
    %68 = tpu.matmul %66, %67, %cst_26 {dimension_numbers = #tpu.dot_dimension_numbers<[2], [1], [1], [2], [0, 0, 0, 1, 1, 2], [0], [0]>} : vector<4x8x8xbf16>, vector<4x8x32xbf16>, vector<4x8x32xf32> -> vector<4x8x32xf32>
    "tpu.trace_stop"() : () -> ()
    %cst_27 = arith.constant dense<0.000000e+00> : vector<8x32xf32>
    %69 = vector.multi_reduction <add>, %68, %cst_27 [0] : vector<4x8x32xf32> to vector<8x32xf32>
    %c0_28 = arith.constant 0 : index
    %c0_29 = arith.constant 0 : index
    %70 = vector.load %arg8[%c0_28, %c0_29] : memref<1x32xf32, #tpu.memory_space<vmem>>, vector<1x32xf32>
    %71 = vector.shape_cast %70 : vector<1x32xf32> to vector<32xf32>
    %72 = vector.shape_cast %71 : vector<32xf32> to vector<1x32xf32>
    %73 = vector.broadcast %72 : vector<1x32xf32> to vector<8x32xf32>
    %74 = arith.addf %69, %73 : vector<8x32xf32>
    %75 = arith.addf %7, %74 : vector<8x32xf32>
    %c0_30 = arith.constant 0 : index
    %c0_31 = arith.constant 0 : index
    %76 = vector.load %arg9[%c0_30, %c0_31] : memref<1x32xf32, #tpu.memory_space<vmem>>, vector<1x32xf32>
    %77 = vector.shape_cast %76 : vector<1x32xf32> to vector<32xf32>
    %c0_32 = arith.constant 0 : index
    %c0_33 = arith.constant 0 : index
    %78 = vector.load %arg10[%c0_32, %c0_33] : memref<1x32xf32, #tpu.memory_space<vmem>>, vector<1x32xf32>
    %79 = vector.shape_cast %78 : vector<1x32xf32> to vector<32xf32>
    %cst_34 = arith.constant dense<0.000000e+00> : vector<8xf32>
    %80 = vector.multi_reduction <add>, %75, %cst_34 [1] : vector<8x32xf32> to vector<8xf32>
    %81 = vector.shape_cast %80 : vector<8xf32> to vector<8x1xf32>
    %cst_35 = arith.constant 3.200000e+01 : f32
    %82 = vector.broadcast %cst_35 : f32 to vector<8x1xf32>
    %83 = arith.divf %81, %82 : vector<8x1xf32>
    %84 = vector.broadcast %83 : vector<8x1xf32> to vector<8x32xf32>
    %85 = arith.subf %75, %84 : vector<8x32xf32>
    %86 = vector.broadcast %83 : vector<8x1xf32> to vector<8x32xf32>
    %87 = arith.subf %75, %86 : vector<8x32xf32>
    %88 = arith.mulf %85, %87 : vector<8x32xf32>
    %cst_36 = arith.constant dense<0.000000e+00> : vector<8xf32>
    %89 = vector.multi_reduction <add>, %88, %cst_36 [1] : vector<8x32xf32> to vector<8xf32>
    %90 = vector.shape_cast %89 : vector<8xf32> to vector<8x1xf32>
    %cst_37 = arith.constant 3.200000e+01 : f32
    %91 = vector.broadcast %cst_37 : f32 to vector<8x1xf32>
    %92 = arith.divf %90, %91 : vector<8x1xf32>
    %93 = vector.broadcast %83 : vector<8x1xf32> to vector<8x32xf32>
    %94 = arith.subf %75, %93 : vector<8x32xf32>
    %cst_38 = arith.constant 9.99999974E-6 : f32
    %95 = vector.broadcast %cst_38 : f32 to vector<8x1xf32>
    %96 = arith.addf %92, %95 : vector<8x1xf32>
    %97 = math.rsqrt %96 : vector<8x1xf32>
    %98 = vector.broadcast %97 : vector<8x1xf32> to vector<8x32xf32>
    %99 = arith.mulf %94, %98 : vector<8x32xf32>
    %100 = vector.shape_cast %77 : vector<32xf32> to vector<1x32xf32>
    %101 = vector.broadcast %100 : vector<1x32xf32> to vector<8x32xf32>
    %102 = arith.mulf %99, %101 : vector<8x32xf32>
    %103 = vector.shape_cast %79 : vector<32xf32> to vector<1x32xf32>
    %104 = vector.broadcast %103 : vector<1x32xf32> to vector<8x32xf32>
    %105 = arith.addf %102, %104 : vector<8x32xf32>
    %106 = arith.truncf %105 : vector<8x32xf32> to vector<8x32xbf16>
    %c0_39 = arith.constant 0 : index
    %c0_40 = arith.constant 0 : index
    %107 = vector.load %arg11[%c0_39, %c0_40] : memref<32x64xbf16, #tpu.memory_space<vmem>>, vector<32x64xbf16>
    %cst_41 = arith.constant dense<0.000000e+00> : vector<8x64xf32>
    %108 = tpu.matmul %106, %107, %cst_41 {dimension_numbers = #tpu.dot_dimension_numbers<[1], [0], [0], [1], [0, 0, 1, 1], [], []>} : vector<8x32xbf16>, vector<32x64xbf16>, vector<8x64xf32> -> vector<8x64xf32>
    %c0_42 = arith.constant 0 : index
    %c0_43 = arith.constant 0 : index
    %109 = vector.load %arg12[%c0_42, %c0_43] : memref<1x64xf32, #tpu.memory_space<vmem>>, vector<1x64xf32>
    %110 = vector.shape_cast %109 : vector<1x64xf32> to vector<64xf32>
    %111 = vector.shape_cast %110 : vector<64xf32> to vector<1x64xf32>
    %112 = vector.broadcast %111 : vector<1x64xf32> to vector<8x64xf32>
    %113 = arith.addf %108, %112 : vector<8x64xf32>
    %cst_44 = arith.constant 5.000000e-01 : f32
    %114 = vector.broadcast %cst_44 : f32 to vector<8x64xf32>
    %115 = arith.mulf %114, %113 : vector<8x64xf32>
    %cst_45 = arith.constant 0.707106769 : f32
    %116 = vector.broadcast %cst_45 : f32 to vector<8x64xf32>
    %117 = arith.mulf %113, %116 : vector<8x64xf32>
    %118 = math.erf %117 : vector<8x64xf32>
    %cst_46 = arith.constant 1.000000e+00 : f32
    %119 = vector.broadcast %cst_46 : f32 to vector<8x64xf32>
    %120 = arith.addf %119, %118 : vector<8x64xf32>
    %121 = arith.mulf %115, %120 : vector<8x64xf32>
    %122 = arith.truncf %121 : vector<8x64xf32> to vector<8x64xbf16>
    %c0_47 = arith.constant 0 : index
    %c0_48 = arith.constant 0 : index
    %123 = vector.load %arg13[%c0_47, %c0_48] : memref<64x32xbf16, #tpu.memory_space<vmem>>, vector<64x32xbf16>
    %cst_49 = arith.constant dense<0.000000e+00> : vector<8x32xf32>
    %124 = tpu.matmul %122, %123, %cst_49 {dimension_numbers = #tpu.dot_dimension_numbers<[1], [0], [0], [1], [0, 0, 1, 1], [], []>} : vector<8x64xbf16>, vector<64x32xbf16>, vector<8x32xf32> -> vector<8x32xf32>
    %c0_50 = arith.constant 0 : index
    %c0_51 = arith.constant 0 : index
    %125 = vector.load %arg14[%c0_50, %c0_51] : memref<1x32xf32, #tpu.memory_space<vmem>>, vector<1x32xf32>
    %126 = vector.shape_cast %125 : vector<1x32xf32> to vector<32xf32>
    %127 = vector.shape_cast %126 : vector<32xf32> to vector<1x32xf32>
    %128 = vector.broadcast %127 : vector<1x32xf32> to vector<8x32xf32>
    %129 = arith.addf %124, %128 : vector<8x32xf32>
    %130 = arith.addf %75, %129 : vector<8x32xf32>
    %c0_52 = arith.constant 0 : index
    %c0_53 = arith.constant 0 : index
    %c0_54 = arith.constant 0 : index
    %131 = vector.load %arg15[%c0_52, %c0_53, %c0_54] : memref<1x8x32xf32, #tpu.memory_space<vmem>>, vector<1x8x32xf32>
    %132 = vector.shape_cast %131 : vector<1x8x32xf32> to vector<8x32xf32>
    %133 = vector.shape_cast %130 : vector<8x32xf32> to vector<1x8x32xf32>
    tpu.vector_store %arg15[%c0_52, %c0_53, %c0_54], %133 {strides = array<i32>} : memref<1x8x32xf32, #tpu.memory_space<vmem>>, vector<1x8x32xf32>,
    return
  }
  func.func @transform_0(%arg0: i32, %arg1: i32) -> (i32, i32, i32) {
    %c0_i32 = arith.constant 0 : i32
    %c0_i32_0 = arith.constant 0 : i32
    %c0_i32_1 = arith.constant 0 : i32
    return %arg0, %c0_i32, %c0_i32_0 : i32, i32, i32
  }
  func.func @transform_1(%arg0: i32, %arg1: i32) -> (i32, i32) {
    %c0_i32 = arith.constant 0 : i32
    %c0_i32_0 = arith.constant 0 : i32
    %c0_i32_1 = arith.constant 0 : i32
    return %c0_i32, %c0_i32_0 : i32, i32
  }
  func.func @transform_2(%arg0: i32, %arg1: i32) -> (i32, i32) {
    %c0_i32 = arith.constant 0 : i32
    %c0_i32_0 = arith.constant 0 : i32
    %c0_i32_1 = arith.constant 0 : i32
    return %c0_i32, %c0_i32_0 : i32, i32
  }
  func.func @transform_3(%arg0: i32, %arg1: i32) -> (i32, i32) {
    %c0_i32 = arith.constant 0 : i32
    %c0_i32_0 = arith.constant 0 : i32
    %c0_i32_1 = arith.constant 0 : i32
    return %c0_i32, %c0_i32_0 : i32, i32
  }
  func.func @transform_4(%arg0: i32, %arg1: i32) -> (i32, i32) {
    %c0_i32 = arith.constant 0 : i32
    %c0_i32_0 = arith.constant 0 : i32
    %c0_i32_1 = arith.constant 0 : i32
    return %c0_i32, %c0_i32_0 : i32, i32
  }
  func.func @transform_5(%arg0: i32, %arg1: i32) -> (i32, i32, i32) {
    %c0_i32 = arith.constant 0 : i32
    %c0_i32_0 = arith.constant 0 : i32
    %c0_i32_1 = arith.constant 0 : i32
    %c0_i32_2 = arith.constant 0 : i32
    return %c0_i32, %c0_i32_0, %c0_i32_1 : i32, i32, i32
  }
  func.func @transform_6(%arg0: i32, %arg1: i32) -> (i32, i32) {
    %c0_i32 = arith.constant 0 : i32
    %c0_i32_0 = arith.constant 0 : i32
    %c0_i32_1 = arith.constant 0 : i32
    return %c0_i32, %c0_i32_0 : i32, i32
  }
  func.func @transform_7(%arg0: i32, %arg1: i32) -> (i32, i32) {
    %c0_i32 = arith.constant 0 : i32
    %c0_i32_0 = arith.constant 0 : i32
    %c0_i32_1 = arith.constant 0 : i32
    return %c0_i32, %c0_i32_0 : i32, i32
  }
  func.func @transform_8(%arg0: i32, %arg1: i32) -> (i32, i32) {
    %c0_i32 = arith.constant 0 : i32
    %c0_i32_0 = arith.constant 0 : i32
    %c0_i32_1 = arith.constant 0 : i32
    return %c0_i32, %c0_i32_0 : i32, i32
  }
  func.func @transform_9(%arg0: i32, %arg1: i32) -> (i32, i32) {
    %c0_i32 = arith.constant 0 : i32
    %c0_i32_0 = arith.constant 0 : i32
    %c0_i32_1 = arith.constant 0 : i32
    return %c0_i32, %c0_i32_0 : i32, i32
  }
  func.func @transform_10(%arg0: i32, %arg1: i32) -> (i32, i32) {
    %c0_i32 = arith.constant 0 : i32
    %c0_i32_0 = arith.constant 0 : i32
    %c0_i32_1 = arith.constant 0 : i32
    return %c0_i32, %c0_i32_0 : i32, i32
  }
  func.func @transform_11(%arg0: i32, %arg1: i32) -> (i32, i32) {
    %c0_i32 = arith.constant 0 : i32
    %c0_i32_0 = arith.constant 0 : i32
    %c0_i32_1 = arith.constant 0 : i32
    return %c0_i32, %c0_i32_0 : i32, i32
  }
  func.func @transform_12(%arg0: i32, %arg1: i32) -> (i32, i32) {
    %c0_i32 = arith.constant 0 : i32
    %c0_i32_0 = arith.constant 0 : i32
    %c0_i32_1 = arith.constant 0 : i32
    return %c0_i32, %c0_i32_0 : i32, i32
  }
  func.func @transform_13(%arg0: i32, %arg1: i32) -> (i32, i32, i32) {
    %c0_i32 = arith.constant 0 : i32
    %c0_i32_0 = arith.constant 0 : i32
    return %arg0, %arg1, %c0_i32 : i32, i32, i32
  }
}

</mosaic_0001>

<bundles_post_ra>
// kernel: transformer_forward.3
= control target key start
LH: loop header
LB: loop body
LE: loop exit
PB: predicated region body
PF: predicated region fallthrough
CT: control target
= control target key end

     0   :  { %s2364_s0 = inlined_call_operand.vmem [shape: f32[2,8,32], index: 0, kind: input, shape index: {}]   ;;  %s2365_s1 = inlined_call_operand.vmem [shape: f32[1,32], index: 1, kind: input, shape index: {}]   ;;  %s2366_s2 = inlined_call_operand.vmem [shape: f32[1,32], index: 2, kind: input, shape index: {}]   ;;  %s2367_s3 = inlined_call_operand.vmem [shape: bf16[32,32], index: 3, kind: input, shape index: {}]   ;;  %s2368_s4 = inlined_call_operand.vmem [shape: bf16[32,64], index: 4, kind: input, shape index: {}]   ;;  %s2369_s5 = inlined_call_operand.vmem [shape: bf16[4,8,32], index: 5, kind: input, shape index: {}]   ;;  %s2370_s6 = inlined_call_operand.vmem [shape: f32[1,32], index: 6, kind: input, shape index: {}]   ;;  %s2371_s7 = inlined_call_operand.vmem [shape: f32[1,32], index: 7, kind: input, shape index: {}]   ;;  %s2372_s8 = inlined_call_operand.vmem [shape: f32[1,32], index: 8, kind: input, shape index: {}]   ;;  %s2373_s9 = inlined_call_operand.vmem [shape: bf16[32,64], index: 9, kind: input, shape index: {}]   ;;  %s2374_s10 = inlined_call_operand.vmem [shape: f32[1,64], index: 10, kind: input, shape index: {}]   ;;  %s2375_s11 = inlined_call_operand.vmem [shape: bf16[64,32], index: 11, kind: input, shape index: {}]   ;;  %s2376_s12 = inlined_call_operand.vmem [shape: f32[1,32], index: 12, kind: input, shape index: {}]   ;;  %s2377_s13 = inlined_call_operand.hbm [shape: f32[2,8,32], index: 13, kind: output, shape index: {}]  }
   0x1   :  { %2378 = sst [smem:[#allocation7_spill]] %s2364_s0 }
   0x2   :  { %2379 = sst [smem:[#allocation8_spill]] %s2365_s1 }
   0x3   :  { %2380 = sst [smem:[#allocation9_spill]] %s2366_s2 }
   0x4   :  { %2381 = sst [smem:[#allocation10_spill]] %s2367_s3 }
   0x5   :  { %18 = vsyncpa [#allocation5], 0 }
   0x6   :  { %20 = vsyncpa [#allocation5 + $0x1], 0  ;;  %s2060_s25 = smov 0   ;;  %s2062_s26 = smov 0  }
   0x7   :  { %s2064_s27 = smov 0   ;;  %s2066_s28 = smov 0  }
   0x8   :  { %s2068_s29 = smov 0   ;;  %s2070_s30 = smov 0  }
   0x9 LB: > { %s1608_s14 = sadd.s32 4294967295, %s1981_s30   ;;  %s1609_s15 = sadd.s32 4294967294, %s1981_s30   ;;  %s1981_s30 = sphi %s2070_s30, %s26_s30   ;;  %s1977_s29 = sphi %s2068_s29, %s2392_s29   ;;  %s1973_s28 = sphi %s2066_s28, %s2391_s28   ;;  %s1969_s27 = sphi %s2064_s27, %s2390_s27   ;;  %s1965_s26 = sphi %s2062_s26, %s2389_s26   ;;  %s1961_s25 = sphi %s2060_s25, %s2388_s25  }
   0xa   : > { %s38_s16 = sadd.s32 1, %s1977_s29  ;;  %s325_s17 = sadd.s32 1, %s1969_s27 }
   0xb   : > { %p40_p0 = scmp.ge.s32.totalorder %s38_s16, 2  ;;  %p335_p1 = scmp.ne.s32.totalorder %s1969_s27, %s1965_s26 }
   0xc   : > { %p336_p2 = scmp.eq.s32.totalorder %s1608_s14, 1  ;;  %p341_p3 = scmp.ne.s32.totalorder %s1965_s26, %s1961_s25 }
   0xd   : > { %s2394_s16 = smov (%p40_p0, %s38_s16), 0  ;;  %p342_p5 = scmp.eq.s32.totalorder %s1609_s15, 1 }
   0xe   : > { %p2100_p4 = por %p336_p2, %p335_p1  ;;  %s320_s19 = ssub.s32 %s1977_s29, %s2394_s16 }
   0xf   : > { %p1612_p6 = scmp.ge.s32.totalorder %s1981_s30, 1  ;;  %p323_p7 = scmp.eq.s32.totalorder %s320_s19, 0 }
  0x10   : > { %p2107_p8 = por %p342_p5, %p341_p3  ;;  %p403_p9 = scmp.lt.s32.totalorder %s1981_s30, 3 }
  0x11   : > { %s2113_s21 = scalar_select %p323_p7, %s1969_s27, %s325_s17  }
  0x12   : > { %p404_p10 = pnand %p1612_p6, %p403_p9 }
  0x13   : > { %p446_p11 = scmp.lt.s32.totalorder (!%p404_p10), %s1973_s28, 1  ;;  %vm458_vm0 = vcmask (!%p404_p10), 261120   ;;  %s2384_s0 = sld [smem:[#allocation7_spill]] (!%p404_p10)  ;;  %v1869_v12 = vld [vmem:[%s2368_s4] sm:$0xff] (!%p404_p10)   ;;  %v1983_v14 = vmov (!%p404_p10), 0.0   ;;  %v1870_v15 = vld [vmem:[%s2368_s4 + $0x8] sm:$0xff] (!%p404_p10)  }
  0x14   : > { %407 = sbr.rel (%p404_p10) target bundleno = 2489 (0x9b9), region = 72  ;;  %s2385_s3 = sld [smem:[#allocation10_spill]] (!%p404_p10)  ;;  %1700 = vmatprep.subr.bf16.mxu0 (!%p404_p10), %v1983_v14  ;;  %1708 = vmatprep.subr.bf16.mxu1 (!%p404_p10), %v1983_v14  ;;  %vm1984_vm1 = vmmov (!%p404_p10), 0   ;;  %vm561_vm2 = vcmask (!%p404_p10), 60416   ;;  %vm706_vm3 = vcmask (!%p404_p10), 64512   ;;  %vm946_vm4 = vcmask (!%p404_p10), 1043456  }
  0x15   : > { %1701 = vmatpush3.bf16.msra.mxu0 (!%p404_p10), %v1869_v12  ;;  %1704 = vmatprep.mubr.msk.bf16.mxu0 (!%p404_p10), %vm1984_vm1, %v1983_v14  ;;  %s2386_s1 = sld [smem:[#allocation8_spill]] (!%p404_p10)  ;;  %s2387_s2 = sld [smem:[#allocation9_spill]] (!%p404_p10)  ;;  %vm1477_vm5 = vcmask (!%p404_p10), 523264  }
  0x16   : > { %1702 = vmatprep.subr.bf16.mxu0 (!%p404_p10), %v1983_v14  ;;  %1712 = vmatprep.mubr.msk.bf16.mxu1 (!%p404_p10), %vm1984_vm1, %v1983_v14  ;;  %s1985_s14 = smov (!%p404_p10), 120   ;;  %s1987_s17 = smov (!%p404_p10), 104  }
  0x17   : > { %s1988_s19 = smov (!%p404_p10), 96   ;;  %s1655_s24 = sshll.u32 (!%p404_p10), %s1973_s28, 7 }
  0x19   : > { %1703 = vmatpush3.bf16.msra.mxu0 (!%p404_p10), %v1870_v15 }
  0x1a   : > { %v1871_v13 = vld [vmem:[%s2385_s3] sm:$0xff] (!%p404_p10)   ;;  %1716 = vmatprep.subr.bf16.mxu0 (!%p404_p10), %v1983_v14  ;;  %v1872_v16 = vld [vmem:[%s2385_s3 + $0x8] sm:$0xff] (!%p404_p10)  }
  0x1b   : > { %s447_s22 = scalar_select %p446_p11, %s1973_s28, 1  ;;  %1709 = vmatpush3.bf16.msra.mxu1 %v1871_v13  ;;  %v1615_v24 = vld [vmem:[%s2386_s1] ss:$0 sm:$0xff] }
  0x1c   : > { %1710 = vmatprep.subr.bf16.mxu1 %v1983_v14  ;;  %v1616_v26 = vld [vmem:[%s2387_s2] ss:$0 sm:$0xff]  ;;  %s2316_s2 = scalar_lea.hbm %s2377_s13, %s1655_s24 }
  0x1d   : > { %s1614_s23 = sshll.u32 %s447_s22, 3 }
  0x1e   : > { %s449_s15 = scalar_lea.vmem %s2384_s0, %s1614_s23  ;;  %s1989_s0 = smov [#allocation4]  }
  0x1f   : > { %v2120_v0 = vld [vmem:[%s449_s15] sm:$0xff]  ;;  %1711 = vmatpush3.bf16.msra.mxu1 %v1872_v16  ;;  %s1986_s15 = smov 112   ;;  %s1907_s23 = sshll.u32 %s1989_s0, 4  ;;  %s1908_s23 = int_to_ptr.vmem [resolvable:$false] %s1907_s23 }
  0x20   : > { %v459_v1 = vsel %vm458_vm0, %v2120_v0, 0.0  ;;  %1722 = vmatprep.subr.bf16.mxu1 %v1983_v14  ;;  %s1909_s3 = scalar_lea.vmem %s1908_s23, 256 }
  0x21   : > { %460 = vadd.xlane.f32.xlu0 %v459_v1 }
  0x25   : > { %601 = vadd.xlane.f32.xlu0 %v459_v1 }
  0xae   : > { %v461_v2 = vpop.xlane.xlu0 %460 }
  0xaf   : > { %v463_v3 = vmul.f32 0.03125, %v461_v2 }
  0xb1   : > { %v464_v4 = vsub.f32 %v2120_v0, %v463_v3 }
  0xb2   : > { %v602_v5 = vpop.xlane.xlu0 %601 }
  0xb3   : > { %v604_v6 = vmul.f32 0.03125, %v602_v5  ;;  %v465_v7 = vmul.f32 %v464_v4, %v464_v4 }
  0xb5   : > { %v605_v8 = vsub.f32 %v2120_v0, %v604_v6  ;;  %v466_v9 = vsel %vm458_vm0, %v465_v7, 0.0 }
  0xb6   : > { %467 = vadd.xlane.f32.xlu1 %v466_v9 }
  0xb7   : > { %v606_v10 = vmul.f32 %v605_v8, %v605_v8 }
  0xb9   : > { %v607_v11 = vsel %vm458_vm0, %v606_v10, 0.0 }
  0xba   : > { %608 = vadd.xlane.f32.xlu1 %v607_v11 }
 0x143   : > { %v468_v17 = vpop.xlane.xlu1 %467 }
 0x144   : > { %v469_v18 = vmul.f32 0.03125, %v468_v17 }
 0x146   : > { %v470_v19 = vadd.f32 1e-05, %v469_v18 }
 0x147   : > { %v609_v20 = vpop.xlane.xlu1 %608 }
 0x148   : > { %1879 = vrsqrt.f32 %v470_v19  ;;  %v610_v21 = vmul.f32 0.03125, %v609_v20 }
 0x14a   : > { %v611_v22 = vadd.f32 1e-05, %v610_v21 }
 0x14c   : > { %1881 = vrsqrt.f32 %v611_v22 }
 0x152   : > { %v1880_v23 = vpop.eup %1879 }
 0x153   : > { %v472_v25 = vmul.f32 %v1880_v23, %v464_v4 }
 0x155   : > { %v479_v27 = vmul.f32 %v1615_v24, %v472_v25 }
 0x156   : > { %v1882_v28 = vpop.eup %1881 }
 0x157   : > { %v486_v29 = vadd.f32 %v1616_v26, %v479_v27  ;;  %v613_v30 = vmul.f32 %v1882_v28, %v605_v8 }
 0x159   : > { %v487_v31 = vpack.c.bf16 %v486_v29, %v486_v29  ;;  %v620_v32 = vmul.f32 %v1615_v24, %v613_v30 }
 0x15b   : > { %1705 = vmatmul.mubr.msk.bf16.vlgmr.msra.gmra.mrb[0].mxu0 %vm458_vm0, %v487_v31  ;;  %v627_v33 = vadd.f32 %v1616_v26, %v620_v32 }
 0x15c   : > { %1718 = vmatprep.mubr.msk.bf16.mxu0 %vm1984_vm1, %v1983_v14 }
 0x15d   : > { %v628_v34 = vpack.c.bf16 %v627_v33, %v627_v33 }
 0x15f   : > { %1713 = vmatmul.mubr.msk.bf16.vlgmr.msra.gmra.mrb[0].mxu1 %vm458_vm0, %v628_v34 }
 0x160   : > { %1724 = vmatprep.mubr.msk.bf16.mxu1 %vm1984_vm1, %v1983_v14 }
 0x22e   : > { %v541_v35 = vpop.f32.mrb[0].mxu0 }
 0x22f   : > { %v2162_v36 = vpack.c.bf16 %v541_v35, %v541_v35  ;;  %548 = vrot.lane.b32.xlu0 %v541_v35, %s1985_s14  ;;  %v1706_v37 = vpop.f32.mrb[1].mxu0  ;;  %551 = vrot.lane.b32.xlu1 %v541_v35, %s1986_s15 }
 0x230   : > { %v544_v38 = vpop.f32.mrb[2].mxu0 }
 0x231   : > { %562 = vst.msk [vmem:[#allocation2] sm:$0xf] %vm561_vm2, %v2162_v36  ;;  %v1707_v39 = vpop.f32.mrb[3].mxu0 }
 0x232   : > { %v682_v40 = vpop.f32.mrb[0].mxu1 }
 0x233   : > { %554 = vrot.lane.b32.xlu1 %v541_v35, %s1987_s17  ;;  %692 = vrot.lane.b32.xlu0 %v682_v40, %s1986_s15  ;;  %v1714_v41 = vpop.f32.mrb[1].mxu1  ;;  %v698_v46 = vpack.c.bf16 %v682_v40, %v682_v40 }
 0x234   : > { %v685_v42 = vpop.f32.mrb[2].mxu1 }
 0x235   : > { %v1715_v43 = vpop.f32.mrb[3].mxu1 }
 0x237   : > { %689 = vrot.lane.b32.xlu1 %v682_v40, %s1985_s14 }
 0x238   : > { %v702_v44 = vld [vmem:[#allocation2] sm:$0xf] }
 0x239   : > { %v711_v45 = vsel %vm706_vm3, %v702_v44, 0 }
 0x23a   : > { %1717 = vmatpush3.bf16.xpose.msra.mxu0 %v711_v45 }
 0x23b   : > { %695 = vrot.lane.b32.xlu1 %v682_v40, %s1987_s17  ;;  %1728 = vmatprep.subr.bf16.mxu0 %v1983_v14 }
 0x241   : > { %1719 = vmatmul.mubr.msk.bf16.vlgmr.msra.gmra.mrb[4].mxu0 %vm706_vm3, %v698_v46 }
 0x242   : > { %1730 = vmatprep.mubr.msk.bf16.mxu0 %vm1984_vm1, %v1983_v14 }
 0x2a1   : > { %v552_v47 = vpop.permute.xlu1 %551  ;;  %v549_v48 = vpop.permute.xlu0 %548 }
 0x2a2   : > { %v2171_v49 = vpack.c.bf16 %v552_v47, %v552_v47  ;;  %v2173_v50 = vpack.c.bf16 %v549_v48, %v549_v48 }
 0x2a4   : > { %564 = vst.msk [vmem:[#allocation2 + $0x8] sm:$0xf] %vm561_vm2, %v2171_v49  ;;  %563 = vst.msk [vmem:[#allocation2 + $0x4] sm:$0xf] %vm561_vm2, %v2173_v50 }
 0x2a5   : > { %v555_v51 = vpop.permute.xlu1 %554  ;;  %v693_v57 = vpop.permute.xlu0 %692 }
 0x2a6   : > { %v2179_v52 = vpack.c.bf16 %v555_v51, %v555_v51  ;;  %v700_v60 = vpack.c.bf16 %v693_v57, %v693_v57 }
 0x2a8   : > { %565 = vst.msk [vmem:[#allocation2 + $0xc] sm:$0xf] %vm561_vm2, %v2179_v52 }
 0x2a9   : > { %v690_v58 = vpop.permute.xlu1 %689 }
 0x2aa   : > { %v699_v61 = vpack.c.bf16 %v690_v58, %v690_v58 }
 0x2ab   : > { %v704_v53 = vld [vmem:[#allocation2 + $0x8] sm:$0xf]  ;;  %v703_v54 = vld [vmem:[#allocation2 + $0x4] sm:$0xf] }
 0x2ac   : > { %v803_v55 = vsel %vm706_vm3, %v704_v53, 0  ;;  %v757_v56 = vsel %vm706_vm3, %v703_v54, 0 }
 0x2ad   : > { %1729 = vmatpush3.bf16.xpose.msra.mxu0 %v803_v55  ;;  %1723 = vmatpush3.bf16.xpose.msra.mxu1 %v757_v56  ;;  %v696_v63 = vpop.permute.xlu1 %695 }
 0x2ae   : > { %1734 = vmatprep.subr.bf16.mxu1 %v1983_v14  ;;  %1740 = vmatprep.subr.bf16.mxu0 %v1983_v14  ;;  %v701_v1 = vpack.c.bf16 %v696_v63, %v696_v63 }
 0x2af   : > { %v705_v59 = vld [vmem:[#allocation2 + $0xc] sm:$0xf] }
 0x2b0   : > { %v849_v62 = vsel %vm706_vm3, %v705_v59, 0 }
 0x2b4   : > { %1725 = vmatmul.mubr.msk.bf16.vlgmr.msra.gmra.mrb[4].mxu1 %vm706_vm3, %v699_v61  ;;  %1731 = vmatmul.mubr.msk.bf16.vlgmr.msra.gmra.mrb[8].mxu0 %vm706_vm3, %v700_v60 }
 0x2b5   : > { %1735 = vmatpush3.bf16.xpose.msra.mxu1 %v849_v62  ;;  %1736 = vmatprep.mubr.msk.bf16.mxu1 %vm1984_vm1, %v1983_v14 }
 0x2b6   : > { %1746 = vmatprep.subr.bf16.mxu1 %v1983_v14  ;;  %1742 = vmatprep.mubr.msk.bf16.mxu0 %vm1984_vm1, %v1983_v14 }
 0x2bc   : > { %1737 = vmatmul.mubr.msk.bf16.vlgmr.msra.gmra.mrb[8].mxu1 %vm706_vm3, %v701_v1 }
 0x2bd   : > { %1748 = vmatprep.mubr.msk.bf16.mxu1 %vm1984_vm1, %v1983_v14 }
 0x314   : > { %v747_v2 = vpop.f32.mrb[4].mxu0 }
 0x315   : > { %v1720_v3 = vpop.f32.mrb[5].mxu0  ;;  %v891_v4 = vsel %vm706_vm3, %v747_v2, -inf }
 0x316   : > { %892 = vmax.xlane.f32.xlu0 %v891_v4  ;;  %v750_v5 = vpop.f32.mrb[6].mxu0 }
 0x317   : > { %v1721_v6 = vpop.f32.mrb[7].mxu0 }
 0x387   : > { %v793_v7 = vpop.f32.mrb[4].mxu1  ;;  %v839_v8 = vpop.f32.mrb[8].mxu0 }
 0x388   : > { %v1726_v9 = vpop.f32.mrb[5].mxu1  ;;  %v1732_v10 = vpop.f32.mrb[9].mxu0  ;;  %v894_v11 = vsel %vm706_vm3, %v793_v7, -inf  ;;  %v897_v12 = vsel %vm706_vm3, %v839_v8, -inf }
 0x389   : > { %895 = vmax.xlane.f32.xlu1 %v894_v11  ;;  %v796_v13 = vpop.f32.mrb[6].mxu1  ;;  %898 = vmax.xlane.f32.xlu0 %v897_v12  ;;  %v842_v15 = vpop.f32.mrb[10].mxu0  ;;  %v1133_v9 = vld [vmem:[%s2369_s5 + $0x4] sm:$0xf]  ;;  %v1135_v12 = vld [vmem:[%s2369_s5 + $0xc] sm:$0xf] }
 0x38a   : > { %v1727_v16 = vpop.f32.mrb[7].mxu1  ;;  %v1733_v17 = vpop.f32.mrb[11].mxu0  ;;  %v1186_v11 = vsel %vm946_vm4, %v1133_v9, 0  ;;  %v1134_v13 = vld [vmem:[%s2369_s5 + $0x8] sm:$0xf] }
 0x38f   : > { %v885_v18 = vpop.f32.mrb[8].mxu1 }
 0x390   : > { %v1738_v19 = vpop.f32.mrb[9].mxu1  ;;  %v900_v20 = vsel %vm706_vm3, %v885_v18, -inf }
 0x391   : > { %v888_v21 = vpop.f32.mrb[10].mxu1  ;;  %901 = vmax.xlane.f32.xlu0 %v900_v20  ;;  %v1278_v19 = vsel %vm946_vm4, %v1135_v12, 0 }
 0x392   : > { %v1739_v22 = vpop.f32.mrb[11].mxu1 }
 0x3a3   : > { %v893_v23 = vpop.xlane.xlu0 %892 }
 0x3a4   : > { %v903_v24 = vsub.f32 %v747_v2, %v893_v23  ;;  %v1232_v23 = vsel %vm946_vm4, %v1134_v13, 0  ;;  %v1643_v13 = vld [vmem:[%s2372_s8] ss:$0 sm:$0xff] }
 0x3a6   : > { %v907_v25 = vmul.f32 1.442695, %v903_v24 }
 0x3a8   : > { %1883 = vpow2.f32 %v907_v25 }
 0x3b2   : > { %v1884_v26 = vpop.eup %1883 }
 0x3b3   : > { %v915_v27 = vsel %vm706_vm3, %v1884_v26, 0.0 }
 0x3b4   : > { %916 = vadd.xlane.f32.xlu0 %v915_v27 }
 0x416   : > { %v896_v28 = vpop.xlane.xlu1 %895  ;;  %v899_v29 = vpop.xlane.xlu0 %898 }
 0x417   : > { %v904_v30 = vsub.f32 %v793_v7, %v896_v28  ;;  %v905_v31 = vsub.f32 %v839_v8, %v899_v29  ;;  %v1132_v8 = vld [vmem:[%s2369_s5] sm:$0xf] }
 0x418   : > { %v1140_v10 = vsel %vm946_vm4, %v1132_v8, 0 }
 0x419   : > { %v909_v32 = vmul.f32 1.442695, %v904_v30  ;;  %v911_v33 = vmul.f32 1.442695, %v905_v31 }
 0x41b   : > { %1885 = vpow2.f32 %v909_v32 }
 0x41c   : > { %1887 = vpow2.f32 %v911_v33 }
 0x41e   : > { %v902_v39 = vpop.xlane.xlu0 %901 }
 0x41f   : > { %v906_v40 = vsub.f32 %v885_v18, %v902_v39 }
 0x421   : > { %v913_v41 = vmul.f32 1.442695, %v906_v40 }
 0x423   : > { %1889 = vpow2.f32 %v913_v41 }
 0x425   : > { %v1886_v34 = vpop.eup %1885 }
 0x426   : > { %v1888_v35 = vpop.eup %1887  ;;  %v918_v37 = vsel %vm706_vm3, %v1886_v34, 0.0 }
 0x427   : > { %919 = vadd.xlane.f32.xlu1 %v918_v37  ;;  %v921_v38 = vsel %vm706_vm3, %v1888_v35, 0.0 }
 0x428   : > { %922 = vadd.xlane.f32.xlu0 %v921_v38 }
 0x42d   : > { %v1890_v42 = vpop.eup %1889 }
 0x42e   : > { %v924_v43 = vsel %vm706_vm3, %v1890_v42, 0.0 }
 0x438   : > { %580 = vrot.lane.b32.xlu1 %v2173_v50, %s1988_s19 }
 0x43c   : > { %582 = vrot.lane.b32.xlu1 %v2171_v49, %s1988_s19 }
 0x43e   : > { %578 = vrot.lane.b32.xlu0 %v2162_v36, %s1988_s19 }
 0x441   : > { %v917_v44 = vpop.xlane.xlu0 %916 }
 0x442   : > { %1891 = vrcp.f32 %v917_v44 }
 0x44c   : > { %v1892_v49 = vpop.eup %1891 }
 0x44d   : > { %v931_v51 = vmul.f32 %v1892_v49, %v1884_v26 }
 0x44f   : > { %v935_v58 = vpack.c.bf16 %v931_v51, %v931_v51 }
 0x460   : > { %925 = vadd.xlane.f32.xlu1 %v924_v43 }
 0x471   : > { %584 = vrot.lane.b32.xlu1 %v2179_v52, %s1988_s19  ;;  %s443_s19 = sand.u32 1, %s1965_s26  }
 0x472   : > { %s1613_s22 = sshll.u32 %s443_s19, 3  ;;  %s1524_s28 = scalar_lea.sflag [#allocation5], %s443_s19 }
 0x473   : > { %s445_s14 = scalar_lea.vmem [#allocation4], %s1613_s22 }
 0x474   : > { %s1538_s15 = sshll.u32 %s445_s14, 4  ;;  %s2318_s15 = int_to_ptr.vmem [resolvable:$true] %s1538_s15 }
 0x475   : > { %s1903_s22 = scalar_lea.vmem %s2318_s15, 128  ;;  %p1910_p1 = scmp.lt.s32.totalorder %s2318_s15, %s1908_s23 }
 0x476   : > { %p1904_p12 = scmp.ne.s32.totalorder %s2318_s15, %s1903_s22  ;;  %p1911_p2 = scmp.lt.s32.totalorder %s1909_s3, %s1903_s22 }
 0x478   : > { %p1905_p13 = pnand %p1904_p12, %p2100_p4  ;;  %p1912_p3 = por %p1911_p2, %p1910_p1 }
 0x47a   : > { %p1906_p0 = pneg %p1905_p13 }
 0x47c   : > { %p1913_p5 = pnand %p1912_p3, %p1906_p0 }
 0x4b4   : > { %v920_v45 = vpop.xlane.xlu1 %919 }
 0x4b5   : > { %1893 = vrcp.f32 %v920_v45  ;;  %v923_v46 = vpop.xlane.xlu0 %922 }
 0x4b6   : > { %1895 = vrcp.f32 %v923_v46 }
 0x4b8   : > { %v581_v47 = vpop.permute.xlu1 %580 }
 0x4b9   : > { %591 = vst.msk [vmem:[#allocation3 + $0x4] sm:$0xf] %vm561_vm2, %v581_v47  ;;  %v579_v48 = vpop.permute.xlu0 %578 }
 0x4ba   : > { %590 = vst.msk [vmem:[#allocation3] sm:$0xf] %vm561_vm2, %v579_v48 }
 0x4bc   : > { %v583_v36 = vpop.permute.xlu1 %582 }
 0x4bd   : > { %592 = vst.msk [vmem:[#allocation3 + $0x8] sm:$0xf] %vm561_vm2, %v583_v36 }
 0x4bf   : > { %v1894_v50 = vpop.eup %1893 }
 0x4c0   : > { %v932_v52 = vmul.f32 %v1894_v50, %v1886_v34  ;;  %v940_v53 = vld [vmem:[#allocation3 + $0x4] sm:$0xf]  ;;  %v1896_v60 = vpop.eup %1895 }
 0x4c1   : > { %v939_v54 = vld [vmem:[#allocation3] sm:$0xf]  ;;  %v994_v55 = vsel %vm946_vm4, %v940_v53, 0  ;;  %v933_v62 = vmul.f32 %v1896_v60, %v1888_v35 }
 0x4c2   : > { %v948_v56 = vsel %vm946_vm4, %v939_v54, 0  ;;  %1747 = vmatpush3.bf16.msra.mxu1 %v994_v55  ;;  %v936_v57 = vpack.c.bf16 %v932_v52, %v932_v52 }
 0x4c3   : > { %1741 = vmatpush3.bf16.msra.mxu0 %v948_v56  ;;  %1758 = vmatprep.subr.bf16.mxu1 %v1983_v14  ;;  %v937_v63 = vpack.c.bf16 %v933_v62, %v933_v62  ;;  %v1641_v56 = vld [vmem:[%s2370_s6] ss:$0 sm:$0xff] }
 0x4c4   : > { %1752 = vmatprep.subr.bf16.mxu0 %v1983_v14  ;;  %v941_v59 = vld [vmem:[#allocation3 + $0x8] sm:$0xf] }
 0x4c5   : > { %1749 = vmatmul.mubr.msk.bf16.vlgmr.msra.gmra.mrb[12].mxu1 %vm706_vm3, %v936_v57  ;;  %v1040_v61 = vsel %vm946_vm4, %v941_v59, 0 }
 0x4c6   : > { %1743 = vmatmul.mubr.msk.bf16.vlgmr.msra.gmra.mrb[12].mxu0 %vm706_vm3, %v935_v58  ;;  %1760 = vmatprep.mubr.msk.bf16.mxu1 %vm1984_vm1, %v1983_v14 }
 0x4c7   : > { %1753 = vmatpush3.bf16.msra.mxu0 %v1040_v61  ;;  %1754 = vmatprep.mubr.msk.bf16.mxu0 %vm1984_vm1, %v1983_v14 }
 0x4c8   : > { %1764 = vmatprep.subr.bf16.mxu0 %v1983_v14 }
 0x4ce   : > { %1755 = vmatmul.mubr.msk.bf16.vlgmr.msra.gmra.mrb[16].mxu0 %vm706_vm3, %v937_v63 }
 0x4cf   : > { %1766 = vmatprep.mubr.msk.bf16.mxu0 %vm1984_vm1, %v1983_v14  ;;  %1765 = vmatpush3.bf16.msra.mxu0 %v1140_v10 }
 0x4d0   : > { %1776 = vmatprep.subr.bf16.mxu0 %v1983_v14 }
 0x4ed   : > { %v926_v1 = vpop.xlane.xlu1 %925 }
 0x4ee   : > { %1897 = vrcp.f32 %v926_v1 }
 0x4f1   : > { %v585_v2 = vpop.permute.xlu1 %584 }
 0x4f2   : > { %593 = vst.msk [vmem:[#allocation3 + $0xc] sm:$0xf] %vm561_vm2, %v585_v2 }
 0x4f8   : > { %v1898_v3 = vpop.eup %1897 }
 0x4f9   : > { %v934_v4 = vmul.f32 %v1898_v3, %v1890_v42  ;;  %v942_v5 = vld [vmem:[#allocation3 + $0xc] sm:$0xf] }
 0x4fa   : > { %v1086_v6 = vsel %vm946_vm4, %v942_v5, 0 }
 0x4fb   : > { %1759 = vmatpush3.bf16.msra.mxu1 %v1086_v6  ;;  %v938_v7 = vpack.c.bf16 %v934_v4, %v934_v4  ;;  %v1873_v6 = vld [vmem:[%s2373_s9] sm:$0xff]  }
 0x4fc   : > { %1770 = vmatprep.subr.bf16.mxu1 %v1983_v14 }
 0x4fe   : > { %1761 = vmatmul.mubr.msk.bf16.vlgmr.msra.gmra.mrb[16].mxu1 %vm706_vm3, %v938_v7  ;;  %v1874_v7 = vld [vmem:[%s2373_s9 + $0x8] sm:$0xff]  }
 0x4ff   : > { %1772 = vmatprep.mubr.msk.bf16.mxu1 %vm1984_vm1, %v1983_v14  ;;  %1771 = vmatpush3.bf16.msra.mxu1 %v1186_v11  ;;  %v1642_v11 = vld [vmem:[%s2371_s7] ss:$0 sm:$0xff] }
 0x500   : > { %1782 = vmatprep.subr.bf16.mxu1 %v1983_v14 }
 0x598   : > { %v1030_v15 = vpop.f32.mrb[12].mxu1 }
 0x599   : > { %v984_v16 = vpop.f32.mrb[12].mxu0  ;;  %v1129_v17 = vpack.c.bf16 %v1030_v15, %v1030_v15  ;;  %v1750_v18 = vpop.f32.mrb[13].mxu1 }
 0x59a   : > { %v1128_v20 = vpack.c.bf16 %v984_v16, %v984_v16  ;;  %v1744_v21 = vpop.f32.mrb[13].mxu0  ;;  %v1033_v22 = vpop.f32.mrb[14].mxu1  ;;  %v1875_v18 = vld [vmem:[%s2375_s11] sm:$0xff]  }
 0x59b   : > { %v987_v24 = vpop.f32.mrb[14].mxu0  ;;  %v1751_v25 = vpop.f32.mrb[15].mxu1  ;;  %1773 = vmatmul.mubr.msk.bf16.vlgmr.msra.gmra.mrb[20].mxu1 %vm706_vm3, %v1129_v17  ;;  %v1878_v21 = vld [vmem:[%s2375_s11 + $0x18] sm:$0xff]   ;;  %v1644_v22 = vld [vmem:[%s2374_s10] ss:$0 sm:$0xff] }
 0x59c   : > { %v1745_v26 = vpop.f32.mrb[15].mxu0  ;;  %1767 = vmatmul.mubr.msk.bf16.vlgmr.msra.gmra.mrb[20].mxu0 %vm706_vm3, %v1128_v20  ;;  %1783 = vmatpush3.bf16.msra.mxu1 %v1278_v19  ;;  %v1876_v19 = vld [vmem:[%s2375_s11 + $0x8] sm:$0xff]   ;;  %v1877_v20 = vld [vmem:[%s2375_s11 + $0x10] sm:$0xff]  }
 0x59d   : > { %1777 = vmatpush3.bf16.msra.mxu0 %v1232_v23  ;;  %1778 = vmatprep.mubr.msk.bf16.mxu0 %vm1984_vm1, %v1983_v14 }
 0x59e   : > { %1784 = vmatprep.mubr.msk.bf16.mxu1 %vm1984_vm1, %v1983_v14  ;;  %1788 = vmatprep.subr.bf16.mxu0 %v1983_v14 }
 0x59f   : > { %1796 = vmatprep.subr.bf16.mxu1 %v1983_v14 }
 0x5a1   : > { %v1076_v27 = vpop.f32.mrb[16].mxu0 }
 0x5a2   : > { %v1130_v28 = vpack.c.bf16 %v1076_v27, %v1076_v27  ;;  %v1756_v29 = vpop.f32.mrb[17].mxu0 }
 0x5a3   : > { %v1079_v30 = vpop.f32.mrb[18].mxu0 }
 0x5a4   : > { %v1757_v31 = vpop.f32.mrb[19].mxu0  ;;  %1779 = vmatmul.mubr.msk.bf16.vlgmr.msra.gmra.mrb[24].mxu0 %vm706_vm3, %v1130_v28 }
 0x5a5   : > { %1792 = vmatprep.mubr.msk.bf16.mxu0 %vm1984_vm1, %v1983_v14  ;;  %1789 = vmatpush3.bf16.msra.mxu0 %v1873_v6 }
 0x5a6   : > { %1790 = vmatprep.subr.bf16.mxu0 %v1983_v14 }
 0x5a9   : > { %1791 = vmatpush3.bf16.msra.mxu0 %v1874_v7 }
 0x5d1   : > { %v1122_v32 = vpop.f32.mrb[16].mxu1 }
 0x5d2   : > { %v1131_v33 = vpack.c.bf16 %v1122_v32, %v1122_v32  ;;  %v1762_v34 = vpop.f32.mrb[17].mxu1 }
 0x5d3   : > { %v1125_v35 = vpop.f32.mrb[18].mxu1 }
 0x5d4   : > { %v1763_v37 = vpop.f32.mrb[19].mxu1  ;;  %1785 = vmatmul.mubr.msk.bf16.vlgmr.msra.gmra.mrb[24].mxu1 %vm706_vm3, %v1131_v33  ;;  %v1648_v33 = vld [vmem:[%s2376_s12] ss:$0 sm:$0xff] }
 0x5d5   : > { %1804 = vmatprep.mubr.msk.bf16.mxu1 %vm1984_vm1, %v1983_v14  ;;  %1797 = vmatpush3.bf16.msra.mxu1 %v1875_v18 }
 0x5d6   : > { %1798 = vmatprep.subr.bf16.mxu1 %v1983_v14 }
 0x5d9   : > { %1799 = vmatpush3.bf16.msra.mxu1 %v1876_v19 }
 0x5da   : > { %1800 = vmatprep.subr.bf16.mxu1 %v1983_v14 }
 0x5dd   : > { %1801 = vmatpush3.bf16.msra.mxu1 %v1877_v20 }
 0x5de   : > { %1802 = vmatprep.subr.bf16.mxu1 %v1983_v14 }
 0x5e1   : > { %1803 = vmatpush3.bf16.msra.mxu1 %v1878_v21 }
 0x66e   : > { %v1222_v38 = vpop.f32.mrb[20].mxu1 }
 0x66f   : > { %v1176_v39 = vpop.f32.mrb[20].mxu0  ;;  %v1321_v40 = vsel %vm458_vm0, %v1222_v38, 0.0  ;;  %v1774_v41 = vpop.f32.mrb[21].mxu1 }
 0x670   : > { %v1320_v42 = vsel %vm458_vm0, %v1176_v39, 0.0  ;;  %v1768_v43 = vpop.f32.mrb[21].mxu0  ;;  %v1225_v44 = vpop.f32.mrb[22].mxu1 }
 0x671   : > { %v1322_v45 = vadd.f32 %v1321_v40, %v1320_v42  ;;  %v1179_v46 = vpop.f32.mrb[22].mxu0  ;;  %v1775_v47 = vpop.f32.mrb[23].mxu1 }
 0x672   : > { %v1769_v48 = vpop.f32.mrb[23].mxu0 }
 0x677   : > { %v1268_v36 = vpop.f32.mrb[24].mxu0 }
 0x678   : > { %v1323_v49 = vsel %vm458_vm0, %v1268_v36, 0.0  ;;  %v1780_v50 = vpop.f32.mrb[25].mxu0 }
 0x679   : > { %v1324_v51 = vadd.f32 %v1323_v49, %v1322_v45  ;;  %v1271_v52 = vpop.f32.mrb[26].mxu0 }
 0x67a   : > { %v1781_v53 = vpop.f32.mrb[27].mxu0 }
 0x6a7   : > { %v1314_v54 = vpop.f32.mrb[24].mxu1 }
 0x6a8   : > { %v1325_v55 = vsel %vm458_vm0, %v1314_v54, 0.0  ;;  %v1786_v57 = vpop.f32.mrb[25].mxu1 }
 0x6a9   : > { %v1326_v58 = vadd.f32 %v1325_v55, %v1324_v51  ;;  %v1317_v59 = vpop.f32.mrb[26].mxu1 }
 0x6aa   : > { %v1787_v60 = vpop.f32.mrb[27].mxu1 }
 0x6ab   : > { %v1334_v61 = vadd.f32 %v1641_v56, %v1326_v58 }
 0x6ad   : > { %v1335_v62 = vadd.f32 %v1334_v61, %v2120_v0 }
 0x6af   : > { %v1338_v63 = vsel %vm458_vm0, %v1335_v62, 0.0 }
 0x6b0   : > { %1339 = vadd.xlane.f32.xlu0 %v1338_v63 }
 0x73d   : > { %v1340_v1 = vpop.xlane.xlu0 %1339 }
 0x73e   : > { %v1341_v2 = vmul.f32 0.03125, %v1340_v1 }
 0x740   : > { %v1342_v3 = vsub.f32 %v1335_v62, %v1341_v2 }
 0x742   : > { %v1343_v4 = vmul.f32 %v1342_v3, %v1342_v3 }
 0x744   : > { %v1344_v5 = vsel %vm458_vm0, %v1343_v4, 0.0 }
 0x745   : > { %1345 = vadd.xlane.f32.xlu1 %v1344_v5 }
 0x7d2   : > { %v1346_v0 = vpop.xlane.xlu1 %1345 }
 0x7d3   : > { %v1347_v8 = vmul.f32 0.03125, %v1346_v0 }
 0x7d5   : > { %v1348_v9 = vadd.f32 1e-05, %v1347_v8 }
 0x7d7   : > { %1899 = vrsqrt.f32 %v1348_v9 }
 0x7e1   : > { %v1900_v10 = vpop.eup %1899 }
 0x7e2   : > { %v1350_v12 = vmul.f32 %v1900_v10, %v1342_v3 }
 0x7e4   : > { %v1357_v15 = vmul.f32 %v1642_v11, %v1350_v12 }
 0x7e6   : > { %v1364_v16 = vadd.f32 %v1643_v13, %v1357_v15 }
 0x7e8   : > { %v1365_v17 = vpack.c.bf16 %v1364_v16, %v1364_v16 }
 0x7ea   : > { %1793 = vmatmul.mubr.msk.bf16.vlgmr.msra.gmra.mrb[28].mxu0 %vm458_vm0, %v1365_v17 }
 0x8bd   : > { %v1426_v23 = vpop.f32.mrb[28].mxu0 }
 0x8be   : > { %v1427_v24 = vadd.f32 %v1644_v22, %v1426_v23  ;;  %v1794_v25 = vpop.f32.mrb[29].mxu0 }
 0x8bf   : > { %v1429_v26 = vpop.f32.mrb[30].mxu0 }
 0x8c0   : > { %v1433_v27 = vmul.f32 0.70710677, %v1427_v24  ;;  %v1795_v28 = vpop.f32.mrb[31].mxu0  ;;  %v1432_v14 = vmul.f32 0.5, %v1427_v24 }
 0x8c2   : > { %1901 = verf.f32 %v1433_v27 }
 0x8cc   : > { %v1902_v29 = vpop.eup %1901 }
 0x8cd   : > { %v1435_v30 = vadd.f32 1.0, %v1902_v29 }
 0x8cf   : > { %v1436_v31 = vmul.f32 %v1435_v30, %v1432_v14 }
 0x8d1   : > { %v1437_v32 = vpack.c.bf16 %v1436_v31, %v1436_v31 }
 0x8d3   : > { %1805 = vmatmul.mubr.msk.bf16.vlgmr.msra.gmra.mrb[28].mxu1 %vm1477_vm5, %v1437_v32 }
 0x9a6   : > { %v1515_v34 = vpop.f32.mrb[28].mxu1 }
 0x9a7   : > { %v1516_v35 = vadd.f32 %v1648_v33, %v1515_v34  ;;  %v1806_v37 = vpop.f32.mrb[29].mxu1 }
 0x9a8   : > { %v1518_v38 = vpop.f32.mrb[30].mxu1 }
 0x9a9   : > { %v1521_v39 = vadd.f32 %v1516_v35, %v1335_v62  ;;  %v1807_v40 = vpop.f32.mrb[31].mxu1 }
 0x9ab   : > { %1522 = vst.msk [vmem:[%s445_s14] sm:$0xff] %vm458_vm0, %v1521_v39 }
 0x9ac   : > { %1916 = shalt.err (!%p1913_p5)
}
 0x9ad   : > { %s1917_s1 = scalar_lea.hbm %s2316_s2, 128  ;;  %s1921_s14 = scalar_lea.hbm %s2377_s13, 256 }
 0x9ae   : > { %p1918_p6 = scmp.ne.s32.totalorder %s2316_s2, %s1917_s1  ;;  %p1922_p10 = scmp.lt.u32.totalorder %s2316_s2, %s2377_s13 }
 0x9af   : > { %p1923_p11 = scmp.lt.u32.totalorder %s1921_s14, %s1917_s1  ;;  %p1925_p13 = scmp.lt.u32.totalorder %s1917_s1, %s2316_s2 }
 0x9b0   : > { %p1919_p7 = pnand %p1918_p6, %p2100_p4 }
 0x9b1   : > { %p1924_p12 = por %p1923_p11, %p1922_p10 }
 0x9b2   : > { %p1920_p9 = pneg %p1919_p7 }
 0x9b3   : > { %p1926_p0 = por %p1925_p13, %p1924_p12 }
 0x9b5   : > { %p1927_p1 = pnand %p1926_p0, %p1920_p9 }
 0x9b7   : > { %1930 = shalt.err (!%p1927_p1)
}
 0x9b8   : > { %1808 = dma.vmem_to_hbm [thread:$0]  (%p2100_p4), %s2318_s15, 128, %s2316_s2, %s1524_s28  }
 0x9b9 PF: > { %p1814_p2 = scmp.ge.s32.totalorder %s1981_s30, 2  ;;  %s1550_s3 = sand.u32 1, %s1961_s25  }
 0x9ba   : > { %s1551_s22 = scalar_lea.sflag [#allocation5], %s1550_s3 }
 0x9bb   : > { %p1811_p3 = pnand %p1814_p2, %p2107_p8 }
 0x9bd   : > { %1956 = dma.done.wait (!%p1811_p3), %s1551_s22, 128  }
 0x9be   : > { %1958 = vsyncadd (!%p1811_p3), %s1551_s22, 4294967168  ;;  %s26_s30 = sadd.s32 1, %s1981_s30   ;;  %s2388_s25 = smov %s1965_s26 }
 0x9bf   : > { %p23_p5 = scmp.ge.s32.totalorder %s26_s30, 4   ;;  %s2389_s26 = smov %s1969_s27 }
 0x9c0   : > { %s2390_s27 = smov %s2113_s21  ;;  %s2391_s28 = smov %s1977_s29 }
 0x9c1   : > { %s2392_s29 = smov %s2394_s16  ;;  %25 = sbr.rel (!%p23_p5) target bundleno = 9 (0x9), region = 112 }
 0x9c8   :  { %1556 = vsyncpa [#allocation5], 1 }
 0x9c9   :  { %1558 = vsyncpa [#allocation5 + $0x1], 1 }

// kernel: transformer_forward.2
= control target key start
LH: loop header
LB: loop body
LE: loop exit
PB: predicated region body
PF: predicated region fallthrough
CT: control target
= control target key end

     0   :  { %s2745_s0 = inlined_call_operand.vmem [shape: f32[2,8,32], index: 0, kind: input, shape index: {}]   ;;  %s2746_s1 = inlined_call_operand.vmem [shape: f32[1,32], index: 1, kind: input, shape index: {}]   ;;  %s2747_s2 = inlined_call_operand.vmem [shape: f32[1,32], index: 2, kind: input, shape index: {}]   ;;  %s2748_s3 = inlined_call_operand.vmem [shape: bf16[32,32], index: 3, kind: input, shape index: {}]   ;;  %s2749_s4 = inlined_call_operand.vmem [shape: bf16[32,64], index: 4, kind: input, shape index: {}]   ;;  %s2750_s5 = inlined_call_operand.vmem [shape: bf16[4,8,32], index: 5, kind: input, shape index: {}]   ;;  %s2751_s6 = inlined_call_operand.hbm [shape: f32[1,32], index: 6, kind: input, shape index: {}]   ;;  %s2752_s7 = inlined_call_operand.hbm [shape: f32[1,32], index: 7, kind: input, shape index: {}]   ;;  %s2753_s8 = inlined_call_operand.hbm [shape: f32[1,32], index: 8, kind: input, shape index: {}]   ;;  %s2754_s9 = inlined_call_operand.hbm [shape: bf16[32,64], index: 9, kind: input, shape index: {}]   ;;  %s2755_s10 = inlined_call_operand.hbm [shape: f32[1,64], index: 10, kind: input, shape index: {}]   ;;  %s2756_s11 = inlined_call_operand.vmem [shape: bf16[64,32], index: 11, kind: input, shape index: {}]   ;;  %s2757_s12 = inlined_call_operand.hbm [shape: f32[1,32], index: 12, kind: input, shape index: {}]   ;;  %s2758_s13 = inlined_call_operand.vmem [shape: f32[2,8,32], index: 13, kind: output, shape index: {}]  }
   0x1   :  { %2765 = sst [smem:[#allocation19_spill]] %s2747_s2 }
   0x2   :  { %2766 = sst [smem:[#allocation20_spill]] %s2750_s5 }
   0x3   :  { %2767 = sst [smem:[#allocation21_spill]] %s2752_s7 }
   0x4   :  { %2768 = sst [smem:[#allocation22_spill]] %s2756_s11 }
   0x5   :  { %2769 = sst [smem:[#allocation23_spill]] %s2758_s13 }
   0x6   :  { %18 = vsyncpa [#allocation5], 0 }
   0x7   :  { %19 = vsyncpa [#allocation7], 0 }
   0x8   :  { %20 = vsyncpa [#allocation10], 0 }
   0x9   :  { %21 = vsyncpa [#allocation13], 0  ;;  %s2370_s25 = smov 0   ;;  %s2372_s26 = smov 0  }
   0xa   :  { %s2374_s27 = smov 0  }
   0xb LB: > { %2770 = sst [smem:[#allocation18_spill]] %s2284_s27  ;;  %s2286_s28 = smov [#allocation6]   ;;  %s2284_s27 = sphi %s2374_s27, %s27_s27   ;;  %s2280_s26 = sphi %s2372_s26, %s2786_s26   ;;  %s2276_s25 = sphi %s2370_s25, %s2785_s25  }
   0xc   : > { %s389_s29 = sshll.u32 %s2286_s28, 4  ;;  %s1741_s30 = sadd.s32 4294967295, %s2284_s27   ;;  %s390_s29 = int_to_ptr.vmem [resolvable:$true] %s389_s29 }
   0xd   : > { %p1743_p0 = scmp.ge.s32.totalorder %s2284_s27, 1  ;;  %p350_p1 = scmp.lt.s32.totalorder %s2284_s27, 3 }
   0xe   : > { %p2388_p2 = scmp.eq.s32.totalorder %s1741_s30, 0  ;;  %s2287_s16 = smov [#allocation9]  }
   0xf   : > { %p2392_p3 = pnand %p1743_p0, %p350_p1  ;;  %s410_s17 = sshll.u32 %s2287_s16, 4  ;;  %s2398_s17 = int_to_ptr.vmem [resolvable:$true] %s410_s17 }
  0x10   : > { %s2771_s14 = scalar_select %p2388_p2, 1, 0 }
  0x11   : > { %s2772_s15 = scalar_select %p2392_p3, 1, 0 }
  0x12   : > { %p1975_p4 = pneg %p2392_p3  ;;  %s2774_s7 = sld [smem:[#allocation21_spill]] }
  0x14   : > { %p2402_p5 = pnand %p2388_p2, %p1975_p4 }
  0x16   : > { %p2415_p7 = pneg %p2402_p5 }
  0x18   : > { %s2078_s22 = scalar_lea.hbm %s2774_s7, 16 }
  0x19   : > { %p2079_p6 = scmp.ne.s32.totalorder %s2774_s7, %s2078_s22  ;;  %p2085_p10 = scmp.lt.u32.totalorder %s2078_s22, %s2774_s7 }
  0x1b   : > { %p2081_p8 = pnand %p2415_p7, %p2079_p6 }
  0x1d   : > { %p2082_p9 = pneg %p2081_p8 }
  0x1f   : > { %p2087_p11 = pnand %p2085_p10, %p2082_p9 }
  0x21   : > { %2090 = shalt.err (!%p2087_p11)
}
  0x22   : > { %s2091_s20 = scalar_lea.vmem %s390_s29, 16  ;;  %s2098_s21 = scalar_lea.vmem %s390_s29, 32 }
  0x23   : > { %p2092_p12 = scmp.ne.s32.totalorder %s390_s29, %s2091_s20  ;;  %p2099_p1 = scmp.lt.s32.totalorder %s390_s29, %s390_s29 }
  0x24   : > { %p2100_p4 = scmp.lt.s32.totalorder %s2098_s21, %s2091_s20 }
  0x25   : > { %p2094_p13 = pnand %p2092_p12, %p2415_p7 }
  0x26   : > { %p2101_p2 = por %p2100_p4, %p2099_p1 }
  0x27   : > { %p2095_p0 = pneg %p2094_p13 }
  0x29   : > { %p2102_p3 = pnand %p2101_p2, %p2095_p0 }
  0x2b   : > { %2105 = shalt.err (!%p2102_p3)
}
  0x2c   : > { %1981 = dma.hbm_to_vmem [thread:$0]  (!%p2402_p5), %s2774_s7, 16, %s390_s29, [#allocation7]  }
  0x2d   : > { %s2106_s16 = scalar_lea.hbm %s2754_s9, 256 }
  0x2e   : > { %p2107_p6 = scmp.ne.s32.totalorder %s2754_s9, %s2106_s16  ;;  %p2113_p2 = scmp.lt.u32.totalorder %s2106_s16, %s2754_s9 }
  0x30   : > { %p2109_p8 = pnand %p2107_p6, %p2415_p7 }
  0x32   : > { %p2110_p9 = pneg %p2109_p8 }
  0x34   : > { %p2115_p3 = pnand %p2113_p2, %p2110_p9 }
  0x36   : > { %2118 = shalt.err (!%p2115_p3)
}
  0x37   : > { %s2119_s29 = scalar_lea.vmem %s2398_s17, 256  ;;  %p2127_p13 = scmp.lt.s32.totalorder %s2398_s17, %s2398_s17 }
  0x38   : > { %p2120_p10 = scmp.ne.s32.totalorder %s2398_s17, %s2119_s29  ;;  %p2128_p0 = scmp.lt.s32.totalorder %s2119_s29, %s2119_s29 }
  0x3a   : > { %p2122_p11 = pnand %p2120_p10, %p2415_p7  ;;  %p2129_p1 = por %p2128_p0, %p2127_p13 }
  0x3c   : > { %p2123_p12 = pneg %p2122_p11 }
  0x3e   : > { %p2130_p4 = pnand %p2129_p1, %p2123_p12 }
  0x40   : > { %2133 = shalt.err (!%p2130_p4)
}
  0x41   : > { %s2288_s27 = smov 64   ;;  %s2289_s19 = smov 4  }
  0x42   : > { %1987 = dma.hbm_to_vmem [thread:$0]  (!%p2402_p5), %s2754_s9, 256, %s2398_s17, [#allocation10], %s2288_s27, %s2288_s27, %s2289_s19  }
  0x43   : > { %s2776_s22 = sadd.s32 1, %s2280_s26  ;;  %s2290_s30 = smov [#allocation4]  }
  0x44   : > { %p41_p6 = scmp.ge.s32.totalorder %s2776_s22, 2  ;;  %s378_s16 = sshll.u32 %s2290_s30, 4  ;;  %s379_s16 = int_to_ptr.vmem [resolvable:$true] %s378_s16 }
  0x45   : > { %s2777_s20 = smov %s2776_s22  ;;  %s2291_s21 = smov [#allocation8]  }
  0x46   : > { %s2788_s20 = smov (%p41_p6, %s2777_s20), 0  ;;  %s400_s29 = sshll.u32 %s2291_s21, 4  ;;  %s401_s29 = int_to_ptr.vmem [resolvable:$true] %s400_s29 }
  0x47   : > { %s2134_s11 = scalar_lea.hbm %s2751_s6, 16 }
  0x48   : > { %p2135_p8 = scmp.ne.s32.totalorder %s2751_s6, %s2134_s11  ;;  %p2141_p3 = scmp.lt.u32.totalorder %s2134_s11, %s2751_s6 }
  0x4a   : > { %p2137_p9 = pnand %p2135_p8, %p2415_p7 }
  0x4c   : > { %p2138_p2 = pneg %p2137_p9 }
  0x4e   : > { %p2143_p10 = pnand %p2141_p3, %p2138_p2 }
  0x50   : > { %2146 = shalt.err (!%p2143_p10)
}
  0x51   : > { %s2147_s19 = scalar_lea.vmem %s379_s16, 16  ;;  %s2154_s7 = scalar_lea.vmem %s379_s16, 32 }
  0x52   : > { %p2148_p11 = scmp.ne.s32.totalorder %s379_s16, %s2147_s19  ;;  %p2155_p0 = scmp.lt.s32.totalorder %s379_s16, %s379_s16 }
  0x53   : > { %p2156_p1 = scmp.lt.s32.totalorder %s2154_s7, %s2147_s19 }
  0x54   : > { %p2150_p12 = pnand %p2148_p11, %p2415_p7 }
  0x55   : > { %p2157_p4 = por %p2156_p1, %p2155_p0 }
  0x56   : > { %p2151_p13 = pneg %p2150_p12 }
  0x58   : > { %p2158_p6 = pnand %p2157_p4, %p2151_p13 }
  0x5a   : > { %2161 = shalt.err (!%p2158_p6)
}
  0x5b   : > { %1978 = dma.hbm_to_vmem [thread:$0]  (!%p2402_p5), %s2751_s6, 16, %s379_s16, [#allocation5]  }
  0x5c   : > { %s2162_s23 = scalar_lea.hbm %s2753_s8, 16 }
  0x5d   : > { %p2163_p8 = scmp.ne.s32.totalorder %s2753_s8, %s2162_s23  ;;  %p2169_p3 = scmp.lt.u32.totalorder %s2162_s23, %s2753_s8 }
  0x5f   : > { %p2165_p9 = pnand %p2163_p8, %p2415_p7 }
  0x61   : > { %p2166_p2 = pneg %p2165_p9 }
  0x63   : > { %p2171_p10 = pnand %p2169_p3, %p2166_p2 }
  0x65   : > { %2174 = shalt.err (!%p2171_p10)
}
  0x66   : > { %s2175_s17 = scalar_lea.vmem %s401_s29, 16  ;;  %s2182_s16 = scalar_lea.vmem %s401_s29, 32 }
  0x67   : > { %p2176_p11 = scmp.ne.s32.totalorder %s401_s29, %s2175_s17  ;;  %p2183_p0 = scmp.lt.s32.totalorder %s401_s29, %s401_s29 }
  0x68   : > { %p2184_p1 = scmp.lt.s32.totalorder %s2182_s16, %s2175_s17 }
  0x69   : > { %p2178_p12 = pnand %p2176_p11, %p2415_p7 }
  0x6a   : > { %p2185_p4 = por %p2184_p1, %p2183_p0 }
  0x6b   : > { %p2179_p13 = pneg %p2178_p12 }
  0x6d   : > { %p2186_p6 = pnand %p2185_p4, %p2179_p13 }
  0x6f   : > { %2189 = shalt.err (!%p2186_p6)
}
  0x70   : > { %1984 = dma.hbm_to_vmem [thread:$0]  (!%p2402_p5), %s2753_s8, 16, %s401_s29, [#allocation7]  }
  0x71   : > { %s2292_s7 = smov [#allocation11]   ;;  %s2293_s5 = smov [#allocation12]  }
  0x72   : > { %s424_s2 = sshll.u32 %s2292_s7, 4  ;;  %s438_s11 = sshll.u32 %s2293_s5, 4  ;;  %s425_s2 = int_to_ptr.vmem [resolvable:$true] %s424_s2  ;;  %s439_s11 = int_to_ptr.vmem [resolvable:$true] %s438_s11 }
  0x73   : > { %s2190_s24 = scalar_lea.hbm %s2755_s10, 16 }
  0x74   : > { %p2191_p8 = scmp.ne.s32.totalorder %s2755_s10, %s2190_s24  ;;  %p2197_p3 = scmp.lt.u32.totalorder %s2190_s24, %s2755_s10 }
  0x76   : > { %p2193_p9 = pnand %p2191_p8, %p2415_p7 }
  0x78   : > { %p2194_p2 = pneg %p2193_p9 }
  0x7a   : > { %p2199_p10 = pnand %p2197_p3, %p2194_p2 }
  0x7c   : > { %2202 = shalt.err (!%p2199_p10)
}
  0x7d   : > { %s2203_s29 = scalar_lea.vmem %s425_s2, 16  ;;  %s2210_s16 = scalar_lea.vmem %s425_s2, 32 }
  0x7e   : > { %p2204_p11 = scmp.ne.s32.totalorder %s425_s2, %s2203_s29  ;;  %p2211_p0 = scmp.lt.s32.totalorder %s425_s2, %s425_s2 }
  0x7f   : > { %p2212_p1 = scmp.lt.s32.totalorder %s2210_s16, %s2203_s29 }
  0x80   : > { %p2206_p12 = pnand %p2204_p11, %p2415_p7 }
  0x81   : > { %p2213_p4 = por %p2212_p1, %p2211_p0 }
  0x82   : > { %p2207_p13 = pneg %p2206_p12 }
  0x84   : > { %p2214_p6 = pnand %p2213_p4, %p2207_p13 }
  0x86   : > { %2217 = shalt.err (!%p2214_p6)
}
  0x87   : > { %1990 = dma.hbm_to_vmem [thread:$0]  (!%p2402_p5), %s2755_s10, 16, %s425_s2, [#allocation10]  }
  0x88   : > { %s2218_s13 = scalar_lea.hbm %s2757_s12, 16 }
  0x89   : > { %p2219_p8 = scmp.ne.s32.totalorder %s2757_s12, %s2218_s13  ;;  %p2225_p3 = scmp.lt.u32.totalorder %s2218_s13, %s2757_s12 }
  0x8b   : > { %p2221_p9 = pnand %p2219_p8, %p2415_p7 }
  0x8d   : > { %p2222_p2 = pneg %p2221_p9 }
  0x8f   : > { %p2227_p10 = pnand %p2225_p3, %p2222_p2 }
  0x91   : > { %2230 = shalt.err (!%p2227_p10)
}
  0x92   : > { %s2231_s21 = scalar_lea.vmem %s439_s11, 16  ;;  %s2238_s2 = scalar_lea.vmem %s439_s11, 32 }
  0x93   : > { %p2232_p11 = scmp.ne.s32.totalorder %s439_s11, %s2231_s21  ;;  %p2239_p0 = scmp.lt.s32.totalorder %s439_s11, %s439_s11 }
  0x94   : > { %p2240_p1 = scmp.lt.s32.totalorder %s2238_s2, %s2231_s21 }
  0x95   : > { %p2234_p12 = pnand %p2232_p11, %p2415_p7 }
  0x96   : > { %p2241_p4 = por %p2240_p1, %p2239_p0 }
  0x97   : > { %p2235_p13 = pneg %p2234_p12 }
  0x99   : > { %p2242_p6 = pnand %p2241_p4, %p2235_p13 }
  0x9b   : > { %2245 = shalt.err (!%p2242_p6)
}
  0x9c   : > { %1993 = dma.hbm_to_vmem [thread:$0]  (!%p2402_p5), %s2757_s12, 16, %s439_s11, [#allocation13]  }
  0x9d   : > { %p2778_p8 = scmp.ne.s32.totalorder %s2772_s15, 0 }
  0x9e   : > { %p2779_p9 = scmp.ne.s32.totalorder (!%p2778_p8), %s2771_s14, 0 }
  0x9f   : > { %458 = sbr.rel (%p2778_p8) target bundleno = 2623 (0xa3f), region = 72 }
  0xa6   : > { %2259 = dma.done.wait (%p2779_p9), [#allocation5], 16  }
  0xa7   : > { %2261 = vsyncadd (%p2779_p9), [#allocation5], 4294967280 }
  0xa8   : > { %2263 = dma.done.wait (%p2779_p9), [#allocation7], 32  }
  0xa9   : > { %2265 = vsyncadd (%p2779_p9), [#allocation7], 4294967264 }
  0xaa   : > { %2267 = dma.done.wait (%p2779_p9), [#allocation10], 272  }
  0xab   : > { %2269 = vsyncadd (%p2779_p9), [#allocation10], 4294967024 }
  0xac   : > { %2271 = dma.done.wait (%p2779_p9), [#allocation13], 16  }
  0xad   : > { %2273 = vsyncadd (%p2779_p9), [#allocation13], 4294967280  ;;  %p523_p5 = scmp.lt.s32.totalorder %s2276_s25, 1  ;;  %vm542_vm0 = vcmask 261120   ;;  %v2044_v12 = vld [vmem:[%s2749_s4] sm:$0xff]   ;;  %v2294_v14 = vmov 0.0  }
  0xae   : > { %v2046_v13 = vld [vmem:[%s2748_s3] sm:$0xff]   ;;  %1843 = vmatprep.subr.bf16.mxu0 %v2294_v14  ;;  %1851 = vmatprep.subr.bf16.mxu1 %v2294_v14  ;;  %v2045_v15 = vld [vmem:[%s2749_s4 + $0x8] sm:$0xff]   ;;  %vm2295_vm1 = vmmov 0   ;;  %s2780_s2 = sld [smem:[#allocation19_spill]]  ;;  %vm645_vm2 = vcmask 60416   ;;  %s2296_s17 = smov 120  }
  0xaf   : > { %s2790_s25 = smov (!%p523_p5, %s2276_s25), 1  ;;  %1844 = vmatpush3.bf16.msra.mxu0 %v2044_v12  ;;  %1852 = vmatpush3.bf16.msra.mxu1 %v2046_v13  ;;  %v2047_v16 = vld [vmem:[%s2748_s3 + $0x8] sm:$0xff]   ;;  %v1760_v24 = vld [vmem:[%s2746_s1] ss:$0 sm:$0xff]  ;;  %s2297_s29 = smov 112   ;;  %vm790_vm3 = vcmask 64512  }
  0xb0   : > { %s1758_s15 = sshll.u32 %s2790_s25, 3  ;;  %1845 = vmatprep.subr.bf16.mxu0 %v2294_v14  ;;  %1847 = vmatprep.mubr.msk.bf16.mxu0 %vm2295_vm1, %v2294_v14  ;;  %s2298_s18 = smov 104   ;;  %vm1030_vm4 = vcmask 1043456   ;;  %vm1561_vm5 = vcmask 523264  }
  0xb1   : > { %s526_s11 = scalar_lea.vmem %s2745_s0, %s1758_s15  ;;  %1853 = vmatprep.subr.bf16.mxu1 %v2294_v14  ;;  %1855 = vmatprep.mubr.msk.bf16.mxu1 %vm2295_vm1, %v2294_v14  ;;  %s2299_s28 = smov 96  }
  0xb2   : > { %v2560_v0 = vld [vmem:[%s526_s11] sm:$0xff]  ;;  %s2781_s16 = sld [smem:[#allocation20_spill]]  ;;  %s2782_s30 = sld [smem:[#allocation22_spill]] }
  0xb3   : > { %v543_v1 = vsel %vm542_vm0, %v2560_v0, 0.0  ;;  %1846 = vmatpush3.bf16.msra.mxu0 %v2045_v15  ;;  %1854 = vmatpush3.bf16.msra.mxu1 %v2047_v16  ;;  %s2783_s27 = sld [smem:[#allocation23_spill]] }
  0xb4   : > { %544 = vadd.xlane.f32.xlu0 %v543_v1  ;;  %1859 = vmatprep.subr.bf16.mxu0 %v2294_v14  ;;  %v1761_v26 = vld [vmem:[%s2780_s2] ss:$0 sm:$0xff] }
  0xb5   : > { %1865 = vmatprep.subr.bf16.mxu1 %v2294_v14 }
  0xb8   : > { %685 = vadd.xlane.f32.xlu0 %v543_v1 }
  0xb9   : > { %s533_s19 = scalar_lea.vmem %s2783_s27, %s1758_s15 }
 0x141   : > { %v545_v2 = vpop.xlane.xlu0 %544 }
 0x142   : > { %v547_v3 = vmul.f32 0.03125, %v545_v2 }
 0x144   : > { %v548_v4 = vsub.f32 %v2560_v0, %v547_v3 }
 0x145   : > { %v686_v5 = vpop.xlane.xlu0 %685 }
 0x146   : > { %v688_v6 = vmul.f32 0.03125, %v686_v5  ;;  %v549_v7 = vmul.f32 %v548_v4, %v548_v4 }
 0x148   : > { %v689_v8 = vsub.f32 %v2560_v0, %v688_v6  ;;  %v550_v9 = vsel %vm542_vm0, %v549_v7, 0.0 }
 0x149   : > { %551 = vadd.xlane.f32.xlu1 %v550_v9 }
 0x14a   : > { %v690_v10 = vmul.f32 %v689_v8, %v689_v8 }
 0x14c   : > { %v691_v11 = vsel %vm542_vm0, %v690_v10, 0.0 }
 0x14d   : > { %692 = vadd.xlane.f32.xlu1 %v691_v11 }
 0x1d6   : > { %v552_v17 = vpop.xlane.xlu1 %551 }
 0x1d7   : > { %v553_v18 = vmul.f32 0.03125, %v552_v17 }
 0x1d9   : > { %v554_v19 = vadd.f32 1e-05, %v553_v18 }
 0x1da   : > { %v693_v20 = vpop.xlane.xlu1 %692 }
 0x1db   : > { %2054 = vrsqrt.f32 %v554_v19  ;;  %v694_v21 = vmul.f32 0.03125, %v693_v20 }
 0x1dd   : > { %v695_v22 = vadd.f32 1e-05, %v694_v21 }
 0x1df   : > { %2056 = vrsqrt.f32 %v695_v22 }
 0x1e5   : > { %v2055_v23 = vpop.eup %2054 }
 0x1e6   : > { %v556_v25 = vmul.f32 %v2055_v23, %v548_v4 }
 0x1e8   : > { %v563_v27 = vmul.f32 %v1760_v24, %v556_v25 }
 0x1e9   : > { %v2057_v28 = vpop.eup %2056 }
 0x1ea   : > { %v570_v29 = vadd.f32 %v1761_v26, %v563_v27  ;;  %v697_v30 = vmul.f32 %v2057_v28, %v689_v8 }
 0x1ec   : > { %v571_v31 = vpack.c.bf16 %v570_v29, %v570_v29  ;;  %v704_v32 = vmul.f32 %v1760_v24, %v697_v30 }
 0x1ee   : > { %1848 = vmatmul.mubr.msk.bf16.vlgmr.msra.gmra.mrb[0].mxu0 %vm542_vm0, %v571_v31  ;;  %v711_v33 = vadd.f32 %v1761_v26, %v704_v32 }
 0x1ef   : > { %1861 = vmatprep.mubr.msk.bf16.mxu0 %vm2295_vm1, %v2294_v14 }
 0x1f0   : > { %v712_v34 = vpack.c.bf16 %v711_v33, %v711_v33 }
 0x1f2   : > { %1856 = vmatmul.mubr.msk.bf16.vlgmr.msra.gmra.mrb[0].mxu1 %vm542_vm0, %v712_v34 }
 0x1f3   : > { %1867 = vmatprep.mubr.msk.bf16.mxu1 %vm2295_vm1, %v2294_v14 }
 0x2c1   : > { %v625_v35 = vpop.f32.mrb[0].mxu0 }
 0x2c2   : > { %v2602_v36 = vpack.c.bf16 %v625_v35, %v625_v35  ;;  %632 = vrot.lane.b32.xlu0 %v625_v35, %s2296_s17  ;;  %v1849_v37 = vpop.f32.mrb[1].mxu0  ;;  %635 = vrot.lane.b32.xlu1 %v625_v35, %s2297_s29 }
 0x2c3   : > { %v628_v38 = vpop.f32.mrb[2].mxu0 }
 0x2c4   : > { %646 = vst.msk [vmem:[#allocation2] sm:$0xf] %vm645_vm2, %v2602_v36  ;;  %v1850_v39 = vpop.f32.mrb[3].mxu0 }
 0x2c5   : > { %v766_v40 = vpop.f32.mrb[0].mxu1 }
 0x2c6   : > { %638 = vrot.lane.b32.xlu1 %v625_v35, %s2298_s18  ;;  %776 = vrot.lane.b32.xlu0 %v766_v40, %s2297_s29  ;;  %v1857_v41 = vpop.f32.mrb[1].mxu1  ;;  %v782_v46 = vpack.c.bf16 %v766_v40, %v766_v40 }
 0x2c7   : > { %v769_v42 = vpop.f32.mrb[2].mxu1 }
 0x2c8   : > { %v1858_v43 = vpop.f32.mrb[3].mxu1 }
 0x2ca   : > { %773 = vrot.lane.b32.xlu1 %v766_v40, %s2296_s17 }
 0x2cb   : > { %v786_v44 = vld [vmem:[#allocation2] sm:$0xf] }
 0x2cc   : > { %v795_v45 = vsel %vm790_vm3, %v786_v44, 0 }
 0x2cd   : > { %1860 = vmatpush3.bf16.xpose.msra.mxu0 %v795_v45 }
 0x2ce   : > { %779 = vrot.lane.b32.xlu1 %v766_v40, %s2298_s18  ;;  %1871 = vmatprep.subr.bf16.mxu0 %v2294_v14 }
 0x2d4   : > { %1862 = vmatmul.mubr.msk.bf16.vlgmr.msra.gmra.mrb[4].mxu0 %vm790_vm3, %v782_v46 }
 0x2d5   : > { %1873 = vmatprep.mubr.msk.bf16.mxu0 %vm2295_vm1, %v2294_v14 }
 0x334   : > { %v636_v47 = vpop.permute.xlu1 %635  ;;  %v633_v48 = vpop.permute.xlu0 %632 }
 0x335   : > { %v2611_v49 = vpack.c.bf16 %v636_v47, %v636_v47  ;;  %v2613_v50 = vpack.c.bf16 %v633_v48, %v633_v48 }
 0x337   : > { %648 = vst.msk [vmem:[#allocation2 + $0x8] sm:$0xf] %vm645_vm2, %v2611_v49  ;;  %647 = vst.msk [vmem:[#allocation2 + $0x4] sm:$0xf] %vm645_vm2, %v2613_v50 }
 0x338   : > { %v639_v51 = vpop.permute.xlu1 %638  ;;  %v777_v57 = vpop.permute.xlu0 %776 }
 0x339   : > { %v2619_v52 = vpack.c.bf16 %v639_v51, %v639_v51  ;;  %v784_v60 = vpack.c.bf16 %v777_v57, %v777_v57 }
 0x33b   : > { %649 = vst.msk [vmem:[#allocation2 + $0xc] sm:$0xf] %vm645_vm2, %v2619_v52 }
 0x33c   : > { %v774_v58 = vpop.permute.xlu1 %773 }
 0x33d   : > { %v783_v61 = vpack.c.bf16 %v774_v58, %v774_v58 }
 0x33e   : > { %v788_v53 = vld [vmem:[#allocation2 + $0x8] sm:$0xf]  ;;  %v787_v54 = vld [vmem:[#allocation2 + $0x4] sm:$0xf] }
 0x33f   : > { %v887_v55 = vsel %vm790_vm3, %v788_v53, 0  ;;  %v841_v56 = vsel %vm790_vm3, %v787_v54, 0 }
 0x340   : > { %1872 = vmatpush3.bf16.xpose.msra.mxu0 %v887_v55  ;;  %1866 = vmatpush3.bf16.xpose.msra.mxu1 %v841_v56  ;;  %v780_v63 = vpop.permute.xlu1 %779 }
 0x341   : > { %1877 = vmatprep.subr.bf16.mxu1 %v2294_v14  ;;  %1883 = vmatprep.subr.bf16.mxu0 %v2294_v14  ;;  %v785_v1 = vpack.c.bf16 %v780_v63, %v780_v63 }
 0x342   : > { %v789_v59 = vld [vmem:[#allocation2 + $0xc] sm:$0xf] }
 0x343   : > { %v933_v62 = vsel %vm790_vm3, %v789_v59, 0 }
 0x347   : > { %1868 = vmatmul.mubr.msk.bf16.vlgmr.msra.gmra.mrb[4].mxu1 %vm790_vm3, %v783_v61  ;;  %1874 = vmatmul.mubr.msk.bf16.vlgmr.msra.gmra.mrb[8].mxu0 %vm790_vm3, %v784_v60 }
 0x348   : > { %1878 = vmatpush3.bf16.xpose.msra.mxu1 %v933_v62  ;;  %1879 = vmatprep.mubr.msk.bf16.mxu1 %vm2295_vm1, %v2294_v14 }
 0x349   : > { %1889 = vmatprep.subr.bf16.mxu1 %v2294_v14  ;;  %1885 = vmatprep.mubr.msk.bf16.mxu0 %vm2295_vm1, %v2294_v14 }
 0x34f   : > { %1880 = vmatmul.mubr.msk.bf16.vlgmr.msra.gmra.mrb[8].mxu1 %vm790_vm3, %v785_v1 }
 0x350   : > { %1891 = vmatprep.mubr.msk.bf16.mxu1 %vm2295_vm1, %v2294_v14 }
 0x3a7   : > { %v831_v2 = vpop.f32.mrb[4].mxu0 }
 0x3a8   : > { %v1863_v3 = vpop.f32.mrb[5].mxu0  ;;  %v975_v4 = vsel %vm790_vm3, %v831_v2, -inf }
 0x3a9   : > { %976 = vmax.xlane.f32.xlu0 %v975_v4  ;;  %v834_v5 = vpop.f32.mrb[6].mxu0 }
 0x3aa   : > { %v1864_v6 = vpop.f32.mrb[7].mxu0 }
 0x41a   : > { %v877_v7 = vpop.f32.mrb[4].mxu1  ;;  %v923_v8 = vpop.f32.mrb[8].mxu0 }
 0x41b   : > { %v1869_v9 = vpop.f32.mrb[5].mxu1  ;;  %v1875_v10 = vpop.f32.mrb[9].mxu0  ;;  %v978_v11 = vsel %vm790_vm3, %v877_v7, -inf  ;;  %v981_v12 = vsel %vm790_vm3, %v923_v8, -inf }
 0x41c   : > { %979 = vmax.xlane.f32.xlu1 %v978_v11  ;;  %v880_v13 = vpop.f32.mrb[6].mxu1  ;;  %982 = vmax.xlane.f32.xlu0 %v981_v12  ;;  %v926_v15 = vpop.f32.mrb[10].mxu0  ;;  %v1217_v9 = vld [vmem:[%s2781_s16 + $0x4] sm:$0xf]  ;;  %v1219_v12 = vld [vmem:[%s2781_s16 + $0xc] sm:$0xf] }
 0x41d   : > { %v1870_v16 = vpop.f32.mrb[7].mxu1  ;;  %v1876_v17 = vpop.f32.mrb[11].mxu0  ;;  %v1270_v11 = vsel %vm1030_vm4, %v1217_v9, 0  ;;  %v1218_v13 = vld [vmem:[%s2781_s16 + $0x8] sm:$0xf] }
 0x422   : > { %v969_v18 = vpop.f32.mrb[8].mxu1 }
 0x423   : > { %v1881_v19 = vpop.f32.mrb[9].mxu1  ;;  %v984_v20 = vsel %vm790_vm3, %v969_v18, -inf }
 0x424   : > { %v972_v21 = vpop.f32.mrb[10].mxu1  ;;  %985 = vmax.xlane.f32.xlu0 %v984_v20  ;;  %v1362_v19 = vsel %vm1030_vm4, %v1219_v12, 0 }
 0x425   : > { %v1882_v22 = vpop.f32.mrb[11].mxu1 }
 0x436   : > { %v977_v23 = vpop.xlane.xlu0 %976 }
 0x437   : > { %v987_v24 = vsub.f32 %v831_v2, %v977_v23  ;;  %v1316_v23 = vsel %vm1030_vm4, %v1218_v13, 0  ;;  %v1788_v13 = vld [vmem:[#allocation8] ss:$0 sm:$0xff] }
 0x439   : > { %v991_v25 = vmul.f32 1.442695, %v987_v24 }
 0x43b   : > { %2058 = vpow2.f32 %v991_v25 }
 0x445   : > { %v2059_v26 = vpop.eup %2058 }
 0x446   : > { %v999_v27 = vsel %vm790_vm3, %v2059_v26, 0.0 }
 0x447   : > { %1000 = vadd.xlane.f32.xlu0 %v999_v27 }
 0x4a9   : > { %v980_v28 = vpop.xlane.xlu1 %979  ;;  %v983_v29 = vpop.xlane.xlu0 %982 }
 0x4aa   : > { %v988_v30 = vsub.f32 %v877_v7, %v980_v28  ;;  %v989_v31 = vsub.f32 %v923_v8, %v983_v29  ;;  %v1216_v8 = vld [vmem:[%s2781_s16] sm:$0xf] }
 0x4ab   : > { %v1224_v10 = vsel %vm1030_vm4, %v1216_v8, 0 }
 0x4ac   : > { %v993_v32 = vmul.f32 1.442695, %v988_v30  ;;  %v995_v33 = vmul.f32 1.442695, %v989_v31 }
 0x4ae   : > { %2060 = vpow2.f32 %v993_v32 }
 0x4af   : > { %2062 = vpow2.f32 %v995_v33 }
 0x4b1   : > { %v986_v39 = vpop.xlane.xlu0 %985 }
 0x4b2   : > { %v990_v40 = vsub.f32 %v969_v18, %v986_v39 }
 0x4b4   : > { %v997_v41 = vmul.f32 1.442695, %v990_v40 }
 0x4b6   : > { %2064 = vpow2.f32 %v997_v41 }
 0x4b8   : > { %v2061_v34 = vpop.eup %2060 }
 0x4b9   : > { %v2063_v35 = vpop.eup %2062  ;;  %v1002_v37 = vsel %vm790_vm3, %v2061_v34, 0.0 }
 0x4ba   : > { %1003 = vadd.xlane.f32.xlu1 %v1002_v37  ;;  %v1005_v38 = vsel %vm790_vm3, %v2063_v35, 0.0 }
 0x4bb   : > { %1006 = vadd.xlane.f32.xlu0 %v1005_v38 }
 0x4c0   : > { %v2065_v42 = vpop.eup %2064 }
 0x4c1   : > { %v1008_v43 = vsel %vm790_vm3, %v2065_v42, 0.0 }
 0x4cb   : > { %664 = vrot.lane.b32.xlu1 %v2613_v50, %s2299_s28 }
 0x4cf   : > { %666 = vrot.lane.b32.xlu1 %v2611_v49, %s2299_s28 }
 0x4d1   : > { %662 = vrot.lane.b32.xlu0 %v2602_v36, %s2299_s28 }
 0x4d4   : > { %v1001_v44 = vpop.xlane.xlu0 %1000 }
 0x4d5   : > { %2066 = vrcp.f32 %v1001_v44 }
 0x4df   : > { %v2067_v49 = vpop.eup %2066 }
 0x4e0   : > { %v1015_v51 = vmul.f32 %v2067_v49, %v2059_v26 }
 0x4e2   : > { %v1019_v58 = vpack.c.bf16 %v1015_v51, %v1015_v51 }
 0x4f3   : > { %1009 = vadd.xlane.f32.xlu1 %v1008_v43 }
 0x504   : > { %668 = vrot.lane.b32.xlu1 %v2619_v52, %s2299_s28 }
 0x547   : > { %v1004_v45 = vpop.xlane.xlu1 %1003 }
 0x548   : > { %2068 = vrcp.f32 %v1004_v45  ;;  %v1007_v46 = vpop.xlane.xlu0 %1006 }
 0x549   : > { %2070 = vrcp.f32 %v1007_v46 }
 0x54b   : > { %v665_v47 = vpop.permute.xlu1 %664 }
 0x54c   : > { %675 = vst.msk [vmem:[#allocation3 + $0x4] sm:$0xf] %vm645_vm2, %v665_v47  ;;  %v663_v48 = vpop.permute.xlu0 %662 }
 0x54d   : > { %674 = vst.msk [vmem:[#allocation3] sm:$0xf] %vm645_vm2, %v663_v48 }
 0x54f   : > { %v667_v36 = vpop.permute.xlu1 %666 }
 0x550   : > { %676 = vst.msk [vmem:[#allocation3 + $0x8] sm:$0xf] %vm645_vm2, %v667_v36 }
 0x552   : > { %v2069_v50 = vpop.eup %2068 }
 0x553   : > { %v1016_v52 = vmul.f32 %v2069_v50, %v2061_v34  ;;  %v1024_v53 = vld [vmem:[#allocation3 + $0x4] sm:$0xf]  ;;  %v2071_v60 = vpop.eup %2070 }
 0x554   : > { %v1023_v54 = vld [vmem:[#allocation3] sm:$0xf]  ;;  %v1078_v55 = vsel %vm1030_vm4, %v1024_v53, 0  ;;  %v1017_v62 = vmul.f32 %v2071_v60, %v2063_v35 }
 0x555   : > { %v1032_v56 = vsel %vm1030_vm4, %v1023_v54, 0  ;;  %1890 = vmatpush3.bf16.msra.mxu1 %v1078_v55  ;;  %v1020_v57 = vpack.c.bf16 %v1016_v52, %v1016_v52 }
 0x556   : > { %1884 = vmatpush3.bf16.msra.mxu0 %v1032_v56  ;;  %1901 = vmatprep.subr.bf16.mxu1 %v2294_v14  ;;  %v1021_v63 = vpack.c.bf16 %v1017_v62, %v1017_v62  ;;  %v1786_v56 = vld [vmem:[#allocation4] ss:$0 sm:$0xff] }
 0x557   : > { %1895 = vmatprep.subr.bf16.mxu0 %v2294_v14  ;;  %v1025_v59 = vld [vmem:[#allocation3 + $0x8] sm:$0xf] }
 0x558   : > { %1892 = vmatmul.mubr.msk.bf16.vlgmr.msra.gmra.mrb[12].mxu1 %vm790_vm3, %v1020_v57  ;;  %v1124_v61 = vsel %vm1030_vm4, %v1025_v59, 0 }
 0x559   : > { %1886 = vmatmul.mubr.msk.bf16.vlgmr.msra.gmra.mrb[12].mxu0 %vm790_vm3, %v1019_v58  ;;  %1903 = vmatprep.mubr.msk.bf16.mxu1 %vm2295_vm1, %v2294_v14 }
 0x55a   : > { %1896 = vmatpush3.bf16.msra.mxu0 %v1124_v61  ;;  %1897 = vmatprep.mubr.msk.bf16.mxu0 %vm2295_vm1, %v2294_v14 }
 0x55b   : > { %1907 = vmatprep.subr.bf16.mxu0 %v2294_v14 }
 0x561   : > { %1898 = vmatmul.mubr.msk.bf16.vlgmr.msra.gmra.mrb[16].mxu0 %vm790_vm3, %v1021_v63 }
 0x562   : > { %1909 = vmatprep.mubr.msk.bf16.mxu0 %vm2295_vm1, %v2294_v14  ;;  %1908 = vmatpush3.bf16.msra.mxu0 %v1224_v10 }
 0x563   : > { %1919 = vmatprep.subr.bf16.mxu0 %v2294_v14 }
 0x580   : > { %v1010_v1 = vpop.xlane.xlu1 %1009 }
 0x581   : > { %2072 = vrcp.f32 %v1010_v1 }
 0x584   : > { %v669_v2 = vpop.permute.xlu1 %668 }
 0x585   : > { %677 = vst.msk [vmem:[#allocation3 + $0xc] sm:$0xf] %vm645_vm2, %v669_v2 }
 0x58b   : > { %v2073_v3 = vpop.eup %2072 }
 0x58c   : > { %v1018_v4 = vmul.f32 %v2073_v3, %v2065_v42  ;;  %v1026_v5 = vld [vmem:[#allocation3 + $0xc] sm:$0xf] }
 0x58d   : > { %v1170_v6 = vsel %vm1030_vm4, %v1026_v5, 0 }
 0x58e   : > { %1902 = vmatpush3.bf16.msra.mxu1 %v1170_v6  ;;  %v1022_v7 = vpack.c.bf16 %v1018_v4, %v1018_v4  ;;  %v2048_v6 = vld [vmem:[#allocation9] sm:$0xff]  }
 0x58f   : > { %1913 = vmatprep.subr.bf16.mxu1 %v2294_v14 }
 0x591   : > { %1904 = vmatmul.mubr.msk.bf16.vlgmr.msra.gmra.mrb[16].mxu1 %vm790_vm3, %v1022_v7  ;;  %v2049_v7 = vld [vmem:[#allocation9 + $0x8] sm:$0xff]  }
 0x592   : > { %1915 = vmatprep.mubr.msk.bf16.mxu1 %vm2295_vm1, %v2294_v14  ;;  %1914 = vmatpush3.bf16.msra.mxu1 %v1270_v11  ;;  %v1787_v11 = vld [vmem:[#allocation6] ss:$0 sm:$0xff] }
 0x593   : > { %1925 = vmatprep.subr.bf16.mxu1 %v2294_v14 }
 0x62b   : > { %v1114_v15 = vpop.f32.mrb[12].mxu1 }
 0x62c   : > { %v1068_v16 = vpop.f32.mrb[12].mxu0  ;;  %v1213_v17 = vpack.c.bf16 %v1114_v15, %v1114_v15  ;;  %v1893_v18 = vpop.f32.mrb[13].mxu1 }
 0x62d   : > { %v1212_v20 = vpack.c.bf16 %v1068_v16, %v1068_v16  ;;  %v1887_v21 = vpop.f32.mrb[13].mxu0  ;;  %v1117_v22 = vpop.f32.mrb[14].mxu1  ;;  %v2050_v18 = vld [vmem:[%s2782_s30] sm:$0xff]  }
 0x62e   : > { %v1071_v24 = vpop.f32.mrb[14].mxu0  ;;  %v1894_v25 = vpop.f32.mrb[15].mxu1  ;;  %1916 = vmatmul.mubr.msk.bf16.vlgmr.msra.gmra.mrb[20].mxu1 %vm790_vm3, %v1213_v17  ;;  %v2053_v21 = vld [vmem:[%s2782_s30 + $0x18] sm:$0xff]   ;;  %v1789_v22 = vld [vmem:[#allocation11] ss:$0 sm:$0xff] }
 0x62f   : > { %v1888_v26 = vpop.f32.mrb[15].mxu0  ;;  %1910 = vmatmul.mubr.msk.bf16.vlgmr.msra.gmra.mrb[20].mxu0 %vm790_vm3, %v1212_v20  ;;  %1926 = vmatpush3.bf16.msra.mxu1 %v1362_v19  ;;  %v2051_v19 = vld [vmem:[%s2782_s30 + $0x8] sm:$0xff]   ;;  %v2052_v20 = vld [vmem:[%s2782_s30 + $0x10] sm:$0xff]  }
 0x630   : > { %1920 = vmatpush3.bf16.msra.mxu0 %v1316_v23  ;;  %1921 = vmatprep.mubr.msk.bf16.mxu0 %vm2295_vm1, %v2294_v14 }
 0x631   : > { %1927 = vmatprep.mubr.msk.bf16.mxu1 %vm2295_vm1, %v2294_v14  ;;  %1931 = vmatprep.subr.bf16.mxu0 %v2294_v14 }
 0x632   : > { %1939 = vmatprep.subr.bf16.mxu1 %v2294_v14 }
 0x634   : > { %v1160_v27 = vpop.f32.mrb[16].mxu0 }
 0x635   : > { %v1214_v28 = vpack.c.bf16 %v1160_v27, %v1160_v27  ;;  %v1899_v29 = vpop.f32.mrb[17].mxu0 }
 0x636   : > { %v1163_v30 = vpop.f32.mrb[18].mxu0 }
 0x637   : > { %v1900_v31 = vpop.f32.mrb[19].mxu0  ;;  %1922 = vmatmul.mubr.msk.bf16.vlgmr.msra.gmra.mrb[24].mxu0 %vm790_vm3, %v1214_v28 }
 0x638   : > { %1935 = vmatprep.mubr.msk.bf16.mxu0 %vm2295_vm1, %v2294_v14  ;;  %1932 = vmatpush3.bf16.msra.mxu0 %v2048_v6 }
 0x639   : > { %1933 = vmatprep.subr.bf16.mxu0 %v2294_v14 }
 0x63c   : > { %1934 = vmatpush3.bf16.msra.mxu0 %v2049_v7 }
 0x664   : > { %v1206_v32 = vpop.f32.mrb[16].mxu1 }
 0x665   : > { %v1215_v33 = vpack.c.bf16 %v1206_v32, %v1206_v32  ;;  %v1905_v34 = vpop.f32.mrb[17].mxu1 }
 0x666   : > { %v1209_v35 = vpop.f32.mrb[18].mxu1 }
 0x667   : > { %v1906_v37 = vpop.f32.mrb[19].mxu1  ;;  %1928 = vmatmul.mubr.msk.bf16.vlgmr.msra.gmra.mrb[24].mxu1 %vm790_vm3, %v1215_v33  ;;  %v1793_v33 = vld [vmem:[#allocation12] ss:$0 sm:$0xff] }
 0x668   : > { %1947 = vmatprep.mubr.msk.bf16.mxu1 %vm2295_vm1, %v2294_v14  ;;  %1940 = vmatpush3.bf16.msra.mxu1 %v2050_v18 }
 0x669   : > { %1941 = vmatprep.subr.bf16.mxu1 %v2294_v14 }
 0x66c   : > { %1942 = vmatpush3.bf16.msra.mxu1 %v2051_v19 }
 0x66d   : > { %1943 = vmatprep.subr.bf16.mxu1 %v2294_v14 }
 0x670   : > { %1944 = vmatpush3.bf16.msra.mxu1 %v2052_v20 }
 0x671   : > { %1945 = vmatprep.subr.bf16.mxu1 %v2294_v14 }
 0x674   : > { %1946 = vmatpush3.bf16.msra.mxu1 %v2053_v21 }
 0x701   : > { %v1306_v38 = vpop.f32.mrb[20].mxu1 }
 0x702   : > { %v1260_v39 = vpop.f32.mrb[20].mxu0  ;;  %v1405_v40 = vsel %vm542_vm0, %v1306_v38, 0.0  ;;  %v1917_v41 = vpop.f32.mrb[21].mxu1 }
 0x703   : > { %v1404_v42 = vsel %vm542_vm0, %v1260_v39, 0.0  ;;  %v1911_v43 = vpop.f32.mrb[21].mxu0  ;;  %v1309_v44 = vpop.f32.mrb[22].mxu1 }
 0x704   : > { %v1406_v45 = vadd.f32 %v1405_v40, %v1404_v42  ;;  %v1263_v46 = vpop.f32.mrb[22].mxu0  ;;  %v1918_v47 = vpop.f32.mrb[23].mxu1 }
 0x705   : > { %v1912_v48 = vpop.f32.mrb[23].mxu0 }
 0x70a   : > { %v1352_v36 = vpop.f32.mrb[24].mxu0 }
 0x70b   : > { %v1407_v49 = vsel %vm542_vm0, %v1352_v36, 0.0  ;;  %v1923_v50 = vpop.f32.mrb[25].mxu0 }
 0x70c   : > { %v1408_v51 = vadd.f32 %v1407_v49, %v1406_v45  ;;  %v1355_v52 = vpop.f32.mrb[26].mxu0 }
 0x70d   : > { %v1924_v53 = vpop.f32.mrb[27].mxu0 }
 0x73a   : > { %v1398_v54 = vpop.f32.mrb[24].mxu1 }
 0x73b   : > { %v1409_v55 = vsel %vm542_vm0, %v1398_v54, 0.0  ;;  %v1929_v57 = vpop.f32.mrb[25].mxu1 }
 0x73c   : > { %v1410_v58 = vadd.f32 %v1409_v55, %v1408_v51  ;;  %v1401_v59 = vpop.f32.mrb[26].mxu1 }
 0x73d   : > { %v1930_v60 = vpop.f32.mrb[27].mxu1 }
 0x73e   : > { %v1418_v61 = vadd.f32 %v1786_v56, %v1410_v58 }
 0x740   : > { %v1419_v62 = vadd.f32 %v1418_v61, %v2560_v0 }
 0x742   : > { %v1422_v63 = vsel %vm542_vm0, %v1419_v62, 0.0 }
 0x743   : > { %1423 = vadd.xlane.f32.xlu0 %v1422_v63 }
 0x7d0   : > { %v1424_v1 = vpop.xlane.xlu0 %1423 }
 0x7d1   : > { %v1425_v2 = vmul.f32 0.03125, %v1424_v1 }
 0x7d3   : > { %v1426_v3 = vsub.f32 %v1419_v62, %v1425_v2 }
 0x7d5   : > { %v1427_v4 = vmul.f32 %v1426_v3, %v1426_v3 }
 0x7d7   : > { %v1428_v5 = vsel %vm542_vm0, %v1427_v4, 0.0 }
 0x7d8   : > { %1429 = vadd.xlane.f32.xlu1 %v1428_v5 }
 0x865   : > { %v1430_v8 = vpop.xlane.xlu1 %1429 }
 0x866   : > { %v1431_v9 = vmul.f32 0.03125, %v1430_v8 }
 0x868   : > { %v1432_v10 = vadd.f32 1e-05, %v1431_v9 }
 0x86a   : > { %2074 = vrsqrt.f32 %v1432_v10 }
 0x874   : > { %v2075_v0 = vpop.eup %2074 }
 0x875   : > { %v1434_v12 = vmul.f32 %v2075_v0, %v1426_v3 }
 0x877   : > { %v1441_v15 = vmul.f32 %v1787_v11, %v1434_v12 }
 0x879   : > { %v1448_v16 = vadd.f32 %v1788_v13, %v1441_v15 }
 0x87b   : > { %v1449_v17 = vpack.c.bf16 %v1448_v16, %v1448_v16 }
 0x87d   : > { %1936 = vmatmul.mubr.msk.bf16.vlgmr.msra.gmra.mrb[28].mxu0 %vm542_vm0, %v1449_v17 }
 0x950   : > { %v1510_v23 = vpop.f32.mrb[28].mxu0 }
 0x951   : > { %v1511_v24 = vadd.f32 %v1789_v22, %v1510_v23  ;;  %v1937_v25 = vpop.f32.mrb[29].mxu0 }
 0x952   : > { %v1513_v26 = vpop.f32.mrb[30].mxu0 }
 0x953   : > { %v1517_v27 = vmul.f32 0.70710677, %v1511_v24  ;;  %v1938_v28 = vpop.f32.mrb[31].mxu0  ;;  %v1516_v30 = vmul.f32 0.5, %v1511_v24 }
 0x955   : > { %2076 = verf.f32 %v1517_v27 }
 0x95f   : > { %v2077_v29 = vpop.eup %2076 }
 0x960   : > { %v1519_v31 = vadd.f32 1.0, %v2077_v29 }
 0x962   : > { %v1520_v32 = vmul.f32 %v1519_v31, %v1516_v30 }
 0x964   : > { %v1521_v14 = vpack.c.bf16 %v1520_v32, %v1520_v32 }
 0x966   : > { %1948 = vmatmul.mubr.msk.bf16.vlgmr.msra.gmra.mrb[28].mxu1 %vm1561_vm5, %v1521_v14 }
 0xa39   : > { %v1599_v34 = vpop.f32.mrb[28].mxu1 }
 0xa3a   : > { %v1600_v35 = vadd.f32 %v1793_v33, %v1599_v34  ;;  %v1949_v37 = vpop.f32.mrb[29].mxu1 }
 0xa3b   : > { %v1602_v38 = vpop.f32.mrb[30].mxu1 }
 0xa3c   : > { %v1605_v39 = vadd.f32 %v1600_v35, %v1419_v62  ;;  %v1950_v40 = vpop.f32.mrb[31].mxu1 }
 0xa3e   : > { %1606 = vst.msk [vmem:[%s533_s19] sm:$0xff] %vm542_vm0, %v1605_v39 }
 0xa3f PF: > { %s2784_s7 = sld [smem:[#allocation18_spill]]  ;;  %s2785_s25 = smov %s2280_s26 }
 0xa40   : > { %s2786_s26 = smov %s2788_s20 }
 0xa45   : > { %s27_s27 = sadd.s32 1, %s2784_s7  }
 0xa46   : > { %p24_p7 = scmp.ge.s32.totalorder %s27_s27, 4  }
 0xa48   :  { %26 = sbr.rel (!%p24_p7) target bundleno = 11 (0xb), region = 132 }
 0xa4f   :  { %1632 = vsyncpa [#allocation5], 1 }
 0xa50   :  { %1634 = vsyncpa [#allocation5 + $0x1], 1 }
 0xa51   :  { %1635 = vsyncpa [#allocation7], 1 }
 0xa52   :  { %1636 = vsyncpa [#allocation10], 1 }
 0xa53   :  { %1637 = vsyncpa [#allocation13], 1 }

</bundles_post_ra>
